<compile_context>
chip_gen: v5e
topology: v5e:2x2
jax: 0.10.0
libtpu: 0.0.40
codegen_flags: <defaults>
</compile_context>

<pallas_src>
import functools
import math

import jax
import jax.numpy as jnp
from jax import lax
from jax.experimental import pallas as pl
from jax.experimental.pallas import tpu as pltpu


_ROW_TILE = 512        # token-row tile for plain / LN+linear kernels
_MLP_ROW_TILE = 256    # smaller row tile for the fused LN+MLP kernel (2 resident weights)

_ROW_PARALLEL = pltpu.CompilerParams(dimension_semantics=("parallel",))
# NOTE: at real ViT sizes (D=768, I=3072) the fused-MLP resident weights are ~19 MB
# in f32; on v5e (16 MiB default scoped VMEM) / v7x (64 MiB physical) raise
# pltpu.CompilerParams(vmem_limit_bytes=...) or shrink _MLP_ROW_TILE / use bf16.


# ----------------------------- Pallas kernels ------------------------------

def _gelu_exact(x):
    # PyTorch F.gelu default (exact, erf-based).
    return 0.5 * x * (1.0 + lax.erf(x * (1.0 / math.sqrt(2.0))))


def _const_spec(shape):
    # Whole-array block that stays resident across the (1-D) row grid.
    return pl.BlockSpec(shape, lambda i, _n=len(shape): (0,) * _n)


def _row_tile(n, tile):
    # Full array (always legal) when small, else a multiple-of-8 row tile.
    return n if n <= tile else tile


def _linear_kernel(x_ref, w_ref, b_ref, o_ref, *, act):
    y = jnp.dot(x_ref[...], w_ref[...], preferred_element_type=jnp.float32) + b_ref[...]
    if act == "gelu":
        y = _gelu_exact(y)
    o_ref[...] = y.astype(o_ref.dtype)


def _linear_res_kernel(x_ref, w_ref, b_ref, r_ref, o_ref, *, act):
    y = jnp.dot(x_ref[...], w_ref[...], preferred_element_type=jnp.float32) + b_ref[...]
    if act == "gelu":
        y = _gelu_exact(y)
    o_ref[...] = (y + r_ref[...]).astype(o_ref.dtype)


def pallas_linear(x, w, b, residual=None, act="none"):
    """y = act(x @ w + b) (+ residual).  x:[N,Din], w:[Din,Dout], b:[Dout]."""
    N, Din = x.shape
    Dout = w.shape[1]
    tn = _row_tile(N, _ROW_TILE)
    grid = (pl.cdiv(N, tn),)
    row_in = pl.BlockSpec((tn, Din), lambda i: (i, 0))
    row_out = pl.BlockSpec((tn, Dout), lambda i: (i, 0))
    in_specs = [row_in, _const_spec((Din, Dout)), _const_spec((1, Dout))]
    args = [x, w, b.reshape(1, Dout)]
    if residual is None:
        kernel = functools.partial(_linear_kernel, act=act)
    else:
        kernel = functools.partial(_linear_res_kernel, act=act)
        in_specs.append(row_out)
        args.append(residual)
    return pl.pallas_call(
        kernel,
        grid=grid,
        in_specs=in_specs,
        out_specs=row_out,
        out_shape=jax.ShapeDtypeStruct((N, Dout), jnp.float32),
        compiler_params=_ROW_PARALLEL,
    )(*args)


def _layernorm_kernel(x_ref, g_ref, b_ref, o_ref, *, eps):
    x = x_ref[...]
    mean = jnp.mean(x, axis=-1, keepdims=True)
    cent = x - mean
    var = jnp.mean(cent * cent, axis=-1, keepdims=True)
    o_ref[...] = (cent * lax.rsqrt(var + eps) * g_ref[...] + b_ref[...]).astype(o_ref.dtype)


def pallas_layernorm(x, gamma, beta, eps):
    N, D = x.shape
    tn = _row_tile(N, _ROW_TILE)
    row = pl.BlockSpec((tn, D), lambda i: (i, 0))
    return pl.pallas_call(
        functools.partial(_layernorm_kernel, eps=eps),
        grid=(pl.cdiv(N, tn),),
        in_specs=[row, _const_spec((1, D)), _const_spec((1, D))],
        out_specs=row,
        out_shape=jax.ShapeDtypeStruct((N, D), jnp.float32),
        compiler_params=_ROW_PARALLEL,
    )(x, gamma.reshape(1, D), beta.reshape(1, D))


def _ln_linear_kernel(x_ref, g_ref, bta_ref, w_ref, b_ref, o_ref, *, eps):
    # LayerNorm fused into the consuming matmul (LN is VPU/XLU work hidden under MXU).
    x = x_ref[...]
    mean = jnp.mean(x, axis=-1, keepdims=True)
    cent = x - mean
    var = jnp.mean(cent * cent, axis=-1, keepdims=True)
    xn = cent * lax.rsqrt(var + eps) * g_ref[...] + bta_ref[...]
    y = jnp.dot(xn, w_ref[...], preferred_element_type=jnp.float32) + b_ref[...]
    o_ref[...] = y.astype(o_ref.dtype)


def pallas_ln_linear(x, gamma, beta, w, b, eps):
    """y = LN(x) @ w + b.  Used for LN1 + fused-QKV projection."""
    N, Din = x.shape
    Dout = w.shape[1]
    tn = _row_tile(N, _ROW_TILE)
    row_in = pl.BlockSpec((tn, Din), lambda i: (i, 0))
    row_out = pl.BlockSpec((tn, Dout), lambda i: (i, 0))
    return pl.pallas_call(
        functools.partial(_ln_linear_kernel, eps=eps),
        grid=(pl.cdiv(N, tn),),
        in_specs=[row_in,
                  _const_spec((1, Din)), _const_spec((1, Din)),
                  _const_spec((Din, Dout)), _const_spec((1, Dout))],
        out_specs=row_out,
        out_shape=jax.ShapeDtypeStruct((N, Dout), jnp.float32),
        compiler_params=_ROW_PARALLEL,
    )(x, gamma.reshape(1, Din), beta.reshape(1, Din), w, b.reshape(1, Dout))


def _ln_mlp_kernel(x_ref, g_ref, bta_ref, w1_ref, b1_ref, w2_ref, b2_ref, o_ref, *, eps):
    # out = x + W2 @ gelu(W1 @ LN(x) + b1) + b2  (whole MLP block in one kernel)
    x = x_ref[...]
    mean = jnp.mean(x, axis=-1, keepdims=True)
    cent = x - mean
    var = jnp.mean(cent * cent, axis=-1, keepdims=True)
    xn = cent * lax.rsqrt(var + eps) * g_ref[...] + bta_ref[...]
    mid = jnp.dot(xn, w1_ref[...], preferred_element_type=jnp.float32) + b1_ref[...]
    mid = _gelu_exact(mid)
    y = jnp.dot(mid, w2_ref[...], preferred_element_type=jnp.float32) + b2_ref[...]
    o_ref[...] = (y + x).astype(o_ref.dtype)


def pallas_ln_mlp(x, gamma, beta, w1, b1, w2, b2, eps):
    N, D = x.shape
    inter = w1.shape[1]
    tn = _row_tile(N, _MLP_ROW_TILE)
    row = pl.BlockSpec((tn, D), lambda i: (i, 0))
    return pl.pallas_call(
        functools.partial(_ln_mlp_kernel, eps=eps),
        grid=(pl.cdiv(N, tn),),
        in_specs=[row,
                  _const_spec((1, D)), _const_spec((1, D)),
                  _const_spec((D, inter)), _const_spec((1, inter)),
                  _const_spec((inter, D)), _const_spec((1, D))],
        out_specs=row,
        out_shape=jax.ShapeDtypeStruct((N, D), jnp.float32),
        compiler_params=_ROW_PARALLEL,
    )(x, gamma.reshape(1, D), beta.reshape(1, D),
      w1, b1.reshape(1, inter), w2, b2.reshape(1, D))


def _attention_kernel(qkv_ref, bias_ref, o_ref, *, num_heads, scale):
    _, S, D3 = qkv_ref.shape
    D = D3 // 3
    Dh = D // num_heads
    qkv = qkv_ref[0]                    # (S, 3D), lane-dense load
    bias = bias_ref[0]                  # (1, S) additive key-mask bias
    q_all = qkv[:, :D]
    k_all = qkv[:, D:2 * D]
    v_all = qkv[:, 2 * D:]
    ctx = []
    for h in range(num_heads):          # all heads in one grid step (B steps total)
        lo = h * Dh
        q = q_all[:, lo:lo + Dh]
        k = k_all[:, lo:lo + Dh]
        v = v_all[:, lo:lo + Dh]
        # q @ k^T via transposed contraction on Dh (no explicit K transpose).
        s = lax.dot_general(q, k, (((1,), (1,)), ((), ())),
                            preferred_element_type=jnp.float32)
        s = s * scale + bias
        s = s - jnp.max(s, axis=-1, keepdims=True)
        p = jnp.exp(s)
        p = p * pl.reciprocal(jnp.sum(p, axis=-1, keepdims=True), approx=True)
        ctx.append(jnp.dot(p, v, preferred_element_type=jnp.float32))
    # Head-merge inside the kernel -> lane-dense (S, D) store.
    o_ref[0] = jnp.concatenate(ctx, axis=-1).astype(o_ref.dtype)


def pallas_attention(qkv, attn_bias, num_heads):
    """qkv: [B, S, 3D] fused projections; attn_bias: [B, 1, S] additive.

    Returns head-merged context [B, S, D] (PyTorch (B,S,H,Dh)->(B,S,D) order).
    """
    B, S, D3 = qkv.shape
    D = D3 // 3
    Dh = D // num_heads
    scale = 1.0 / math.sqrt(Dh)
    return pl.pallas_call(
        functools.partial(_attention_kernel, num_heads=num_heads, scale=scale),
        grid=(B,),
        in_specs=[pl.BlockSpec((1, S, D3), lambda b: (b, 0, 0)),
                  pl.BlockSpec((1, 1, S), lambda b: (b, 0, 0))],
        out_specs=pl.BlockSpec((1, S, D), lambda b: (b, 0, 0)),
        out_shape=jax.ShapeDtypeStruct((B, S, D), jnp.float32),
        compiler_params=pltpu.CompilerParams(dimension_semantics=("parallel",)),
    )(qkv, attn_bias)
    # TODO(synk): for long sequences switch to flash-style KV tiling; full (S,S)
    # scores per head are fine at ViT sequence lengths but not beyond a few K.


# --------------------------- model building blocks --------------------------

def vit_layer_forward(h, attn_bias, p, num_heads, eps):
    """Pre-norm ViT layer: LN1 -> MHSA -> +res -> LN2 -> MLP -> +res (4 kernels)."""
    B, S, D = h.shape
    h2 = h.reshape(B * S, D)

    qkv = pallas_ln_linear(h2, p["ln1_g"], p["ln1_b"], p["qkv_w"], p["qkv_b"], eps)
    ctx = pallas_attention(qkv.reshape(B, S, 3 * D), attn_bias, num_heads)  # [B,S,D]

    attn_out = pallas_linear(ctx.reshape(B * S, D), p["ao_w"], p["ao_b"],
                             residual=h2)                                    # residual 1
    out = pallas_ln_mlp(attn_out, p["ln2_g"], p["ln2_b"],
                        p["mi_w"], p["mi_b"], p["mo_w"], p["mo_b"], eps)     # residual 2 inside
    return out.reshape(B, S, D)


def embeddings_forward(pixel_values, p, patch_size, hidden_size):
    """VanillaViTEmbeddings: patch conv (im2col + matmul) + cls token + pos embed."""
    B, C, H, W = pixel_values.shape
    ps = patch_size
    nh, nw = H // ps, W // ps
    # im2col: each patch flattened in (C, ph, pw) order (Conv2d weight layout).
    patches = (pixel_values
               .reshape(B, C, nh, ps, nw, ps)
               .transpose(0, 2, 4, 1, 3, 5)
               .reshape(B * nh * nw, C * ps * ps))
    x = pallas_linear(patches, p["patch_w"], p["patch_b"]).reshape(B, nh * nw, hidden_size)
    cls = jnp.broadcast_to(p["cls_token"], (B, 1, hidden_size))
    x = jnp.concatenate([cls, x], axis=1)
    return x + p["pos_embed"]          # dropout is identity (eval mode)


def build_forward(cfg, side_layer_branches):
    side_layer_branches = tuple(side_layer_branches)
    L = cfg["num_hidden_layers"]
    heads = cfg["num_attention_heads"]
    eps = cfg["layer_norm_eps"]
    D = cfg["hidden_size"]
    Ds = cfg["s_attn_hidden_size"]
    freeze_layer = L  # default _ltt_freeze_layer (ltt_freeze_layers_until not called)

    @jax.jit
    def forward(params, pixel_values, attention_mask):
        h = embeddings_forward(pixel_values, params["embeddings"],
                               cfg["img_patch_size"], D)
        B, S, _ = h.shape

        # TODO(synk): VanillaViTLayer mask semantics assumed HF-style: keep-mask
        # [B, S] -> additive -1e9 bias over keys; kept as [B,1,S] (broadcast
        # over queries/heads inside the attention kernel, never materialized as
        # (B,S,S) in HBM).
        attn_bias = ((1.0 - attention_mask) * jnp.float32(-1e9))[:, None, :]

        side_states = {i_b: 0.0 for i_b in side_layer_branches}
        for i_ly in range(L):
            h = vit_layer_forward(h, attn_bias, params["layers"][i_ly], heads, eps)
            for i_b in side_layer_branches:
                if i_ly >= freeze_layer:
                    continue
                mp = params["s_attn_maps"][i_b][i_ly]
                gmap = pallas_linear(h.reshape(B * S, D), mp["w"], mp["b"], act="gelu")
                side_states[i_b] = side_states[i_b] + gmap.reshape(B, S, Ds)
                side_states[i_b] = vit_layer_forward(
                    side_states[i_b], attn_bias,
                    params["s_attn_layers"][i_b][i_ly], heads, eps)

        h = pallas_layernorm(h.reshape(B * S, D),
                             params["final_ln_g"], params["final_ln_b"],
                             eps).reshape(B, S, D)
        side_outputs = []
        for i_b in side_layer_branches:
            s = side_states[i_b]
            s = pallas_layernorm(s.reshape(B * S, Ds),
                                 params["s_ln_g"][i_b], params["s_ln_b"][i_b],
                                 eps).reshape(B, S, Ds)
            side_outputs.append(s)
        return h, side_outputs

    return forward


# ------------------------------- parameters ---------------------------------

def init_params(key, cfg, num_side_branches):
    D, inter = cfg["hidden_size"], cfg["intermediate_size"]
    Ds, Is = cfg["s_attn_hidden_size"], cfg["s_attn_intermediate_size"]
    C, ps, px = cfg["img_channels"], cfg["img_patch_size"], cfg["img_px_size"]
    L = cfg["num_hidden_layers"]
    P = (px // ps) ** 2
    scale = 0.02

    keys = iter(jax.random.split(key, 512))
    nk = lambda: next(keys)
    nrm = lambda k, shape: jax.random.normal(k, shape, jnp.float32) * scale
    zeros = lambda n: jnp.zeros((n,), jnp.float32)
    ones = lambda n: jnp.ones((n,), jnp.float32)

    def init_vit_layer(d, i):
        return {
            "ln1_g": ones(d), "ln1_b": zeros(d),
            # Q/K/V stored fused [d, 3d] (mathematically identical to 3 separate
            # nn.Linear(d, d) weights concatenated along the output dim).
            "qkv_w": nrm(nk(), (d, 3 * d)), "qkv_b": zeros(3 * d),
            "ao_w": nrm(nk(), (d, d)), "ao_b": zeros(d),
            "ln2_g": ones(d), "ln2_b": zeros(d),
            "mi_w": nrm(nk(), (d, i)), "mi_b": zeros(i),
            "mo_w": nrm(nk(), (i, d)), "mo_b": zeros(d),
        }

    return {
        "embeddings": {
            "cls_token": nrm(nk(), (1, 1, D)),
            "patch_w": nrm(nk(), (C * ps * ps, D)),
            "patch_b": zeros(D),
            "pos_embed": nrm(nk(), (1, P + 1, D)),
        },
        "layers": [init_vit_layer(D, inter) for _ in range(L)],
        "s_attn_maps": [[{"w": nrm(nk(), (D, Ds)), "b": zeros(Ds)}
                         for _ in range(L)] for _ in range(num_side_branches)],
        "s_attn_layers": [[init_vit_layer(Ds, Is) for _ in range(L)]
                          for _ in range(num_side_branches)],
        "final_ln_g": ones(D), "final_ln_b": zeros(D),
        "s_ln_g": [ones(Ds) for _ in range(num_side_branches)],
        "s_ln_b": [zeros(Ds) for _ in range(num_side_branches)],
    }


# ----------------------------------- main ------------------------------------

if __name__ == "__main__":
    cfg = {
        "hidden_size": 32,
        "intermediate_size": 64,
        "s_attn_hidden_size": 32,
        "s_attn_intermediate_size": 64,
        "num_hidden_layers": 2,
        "num_attention_heads": 4,
        "layer_norm_eps": 1e-12,
        "img_channels": 3,
        "img_px_size": 16,
        "img_patch_size": 8,
    }
    num_side_branches = 2
    side_layer_branches = (0, 1)

    key = jax.random.PRNGKey(0)
    kp, kx = jax.random.split(key)
    params = init_params(kp, cfg, num_side_branches)

    B = 2
    pixel_values = jax.random.normal(
        kx, (B, cfg["img_channels"], cfg["img_px_size"], cfg["img_px_size"]),
        jnp.float32)
    S = (cfg["img_px_size"] // cfg["img_patch_size"]) ** 2 + 1  # 4 patches + cls = 5
    attention_mask = jnp.ones((B, S), jnp.float32)

    forward = build_forward(cfg, side_layer_branches)
    hidden, side_outputs = forward(params, pixel_values, attention_mask)
    jax.block_until_ready((hidden, side_outputs))

    assert hidden.shape == (B, S, cfg["hidden_size"])
    assert len(side_outputs) == len(side_layer_branches)
    for s in side_outputs:
        assert s.shape == (B, S, cfg["s_attn_hidden_size"])
    print("KERNEL_OK")
</pallas_src>

<mosaic_0001>
module attributes {stable_mosaic.version = 11 : i64} {
  func.func @_ln_linear_kernel(%arg0: i32, %arg1: memref<10x32xf32, #tpu.memory_space<vmem>>, %arg2: memref<1x32xf32, #tpu.memory_space<vmem>>, %arg3: memref<1x32xf32, #tpu.memory_space<vmem>>, %arg4: memref<32x96xf32, #tpu.memory_space<vmem>>, %arg5: memref<1x96xf32, #tpu.memory_space<vmem>>, %arg6: memref<10x96xf32, #tpu.memory_space<vmem>>) attributes {dimension_semantics = [#tpu.dimension_semantics<parallel>], iteration_bounds = array<i64: 1>, scalar_prefetch = 0 : i64, scratch_operands = 0 : i64, tpu.core_type = #tpu.core_type<tc>, window_params = [{transform_indices = @transform_0, window_bounds = array<i64: 10, 32>}, {pipeline_mode = #tpu.pipeline_mode<synchronous>, transform_indices = @transform_1, window_bounds = array<i64: 1, 32>}, {pipeline_mode = #tpu.pipeline_mode<synchronous>, transform_indices = @transform_2, window_bounds = array<i64: 1, 32>}, {pipeline_mode = #tpu.pipeline_mode<synchronous>, transform_indices = @transform_3, window_bounds = array<i64: 32, 96>}, {pipeline_mode = #tpu.pipeline_mode<synchronous>, transform_indices = @transform_4, window_bounds = array<i64: 1, 96>}, {transform_indices = @transform_5, window_bounds = array<i64: 10, 96>}]} {
    %c0 = arith.constant 0 : index
    %c0_0 = arith.constant 0 : index
    %0 = vector.load %arg1[%c0, %c0_0] : memref<10x32xf32, #tpu.memory_space<vmem>>, vector<10x32xf32>
    %cst = arith.constant dense<0.000000e+00> : vector<10xf32>
    %1 = vector.multi_reduction <add>, %0, %cst [1] : vector<10x32xf32> to vector<10xf32>
    %2 = vector.shape_cast %1 : vector<10xf32> to vector<10x1xf32>
    %cst_1 = arith.constant 3.200000e+01 : f32
    %3 = vector.broadcast %cst_1 : f32 to vector<10x1xf32>
    %4 = arith.divf %2, %3 : vector<10x1xf32>
    %5 = vector.broadcast %4 : vector<10x1xf32> to vector<10x32xf32>
    %6 = arith.subf %0, %5 : vector<10x32xf32>
    %7 = arith.mulf %6, %6 : vector<10x32xf32>
    %cst_2 = arith.constant dense<0.000000e+00> : vector<10xf32>
    %8 = vector.multi_reduction <add>, %7, %cst_2 [1] : vector<10x32xf32> to vector<10xf32>
    %9 = vector.shape_cast %8 : vector<10xf32> to vector<10x1xf32>
    %cst_3 = arith.constant 3.200000e+01 : f32
    %10 = vector.broadcast %cst_3 : f32 to vector<10x1xf32>
    %11 = arith.divf %9, %10 : vector<10x1xf32>
    %cst_4 = arith.constant 9.99999996E-13 : f32
    %12 = vector.broadcast %cst_4 : f32 to vector<10x1xf32>
    %13 = arith.addf %11, %12 : vector<10x1xf32>
    %14 = math.rsqrt %13 : vector<10x1xf32>
    %15 = vector.broadcast %14 : vector<10x1xf32> to vector<10x32xf32>
    %16 = arith.mulf %6, %15 : vector<10x32xf32>
    %c0_5 = arith.constant 0 : index
    %c0_6 = arith.constant 0 : index
    %17 = vector.load %arg2[%c0_5, %c0_6] : memref<1x32xf32, #tpu.memory_space<vmem>>, vector<1x32xf32>
    %18 = vector.broadcast %17 : vector<1x32xf32> to vector<10x32xf32>
    %19 = arith.mulf %16, %18 : vector<10x32xf32>
    %c0_7 = arith.constant 0 : index
    %c0_8 = arith.constant 0 : index
    %20 = vector.load %arg3[%c0_7, %c0_8] : memref<1x32xf32, #tpu.memory_space<vmem>>, vector<1x32xf32>
    %21 = vector.broadcast %20 : vector<1x32xf32> to vector<10x32xf32>
    %22 = arith.addf %19, %21 : vector<10x32xf32>
    %c0_9 = arith.constant 0 : index
    %c0_10 = arith.constant 0 : index
    %23 = vector.load %arg4[%c0_9, %c0_10] : memref<32x96xf32, #tpu.memory_space<vmem>>, vector<32x96xf32>
    %cst_11 = arith.constant dense<0.000000e+00> : vector<10x96xf32>
    %24 = tpu.matmul %22, %23, %cst_11 {dimension_numbers = #tpu.dot_dimension_numbers<[1], [0], [0], [1], [0, 0, 1, 1], [], []>} : vector<10x32xf32>, vector<32x96xf32>, vector<10x96xf32> -> vector<10x96xf32>
    %c0_12 = arith.constant 0 : index
    %c0_13 = arith.constant 0 : index
    %25 = vector.load %arg5[%c0_12, %c0_13] : memref<1x96xf32, #tpu.memory_space<vmem>>, vector<1x96xf32>
    %26 = vector.broadcast %25 : vector<1x96xf32> to vector<10x96xf32>
    %27 = arith.addf %24, %26 : vector<10x96xf32>
    %c0_14 = arith.constant 0 : index
    %c0_15 = arith.constant 0 : index
    %28 = vector.load %arg6[%c0_14, %c0_15] : memref<10x96xf32, #tpu.memory_space<vmem>>, vector<10x96xf32>
    tpu.vector_store %arg6[%c0_14, %c0_15], %27 {strides = array<i32>} : memref<10x96xf32, #tpu.memory_space<vmem>>, vector<10x96xf32>,
    return
  }
  func.func @transform_0(%arg0: i32) -> (i32, i32) {
    %c0_i32 = arith.constant 0 : i32
    %c0_i32_0 = arith.constant 0 : i32
    return %arg0, %c0_i32 : i32, i32
  }
  func.func @transform_1(%arg0: i32) -> (i32, i32) {
    %c0_i32 = arith.constant 0 : i32
    %c0_i32_0 = arith.constant 0 : i32
    %c0_i32_1 = arith.constant 0 : i32
    return %c0_i32, %c0_i32_0 : i32, i32
  }
  func.func @transform_2(%arg0: i32) -> (i32, i32) {
    %c0_i32 = arith.constant 0 : i32
    %c0_i32_0 = arith.constant 0 : i32
    %c0_i32_1 = arith.constant 0 : i32
    return %c0_i32, %c0_i32_0 : i32, i32
  }
  func.func @transform_3(%arg0: i32) -> (i32, i32) {
    %c0_i32 = arith.constant 0 : i32
    %c0_i32_0 = arith.constant 0 : i32
    %c0_i32_1 = arith.constant 0 : i32
    return %c0_i32, %c0_i32_0 : i32, i32
  }
  func.func @transform_4(%arg0: i32) -> (i32, i32) {
    %c0_i32 = arith.constant 0 : i32
    %c0_i32_0 = arith.constant 0 : i32
    %c0_i32_1 = arith.constant 0 : i32
    return %c0_i32, %c0_i32_0 : i32, i32
  }
  func.func @transform_5(%arg0: i32) -> (i32, i32) {
    %c0_i32 = arith.constant 0 : i32
    %c0_i32_0 = arith.constant 0 : i32
    return %arg0, %c0_i32 : i32, i32
  }
}

module attributes {stable_mosaic.version = 11 : i64} {
  func.func @_linear_kernel(%arg0: i32, %arg1: memref<8x192xf32, #tpu.memory_space<vmem>>, %arg2: memref<192x32xf32, #tpu.memory_space<vmem>>, %arg3: memref<1x32xf32, #tpu.memory_space<vmem>>, %arg4: memref<8x32xf32, #tpu.memory_space<vmem>>) attributes {dimension_semantics = [#tpu.dimension_semantics<parallel>], iteration_bounds = array<i64: 1>, scalar_prefetch = 0 : i64, scratch_operands = 0 : i64, tpu.core_type = #tpu.core_type<tc>, window_params = [{transform_indices = @transform_0, window_bounds = array<i64: 8, 192>}, {pipeline_mode = #tpu.pipeline_mode<synchronous>, transform_indices = @transform_1, window_bounds = array<i64: 192, 32>}, {pipeline_mode = #tpu.pipeline_mode<synchronous>, transform_indices = @transform_2, window_bounds = array<i64: 1, 32>}, {transform_indices = @transform_3, window_bounds = array<i64: 8, 32>}]} {
    %c0 = arith.constant 0 : index
    %c0_0 = arith.constant 0 : index
    %0 = vector.load %arg1[%c0, %c0_0] : memref<8x192xf32, #tpu.memory_space<vmem>>, vector<8x192xf32>
    %c0_1 = arith.constant 0 : index
    %c0_2 = arith.constant 0 : index
    %1 = vector.load %arg2[%c0_1, %c0_2] : memref<192x32xf32, #tpu.memory_space<vmem>>, vector<192x32xf32>
    %cst = arith.constant dense<0.000000e+00> : vector<8x32xf32>
    %2 = tpu.matmul %0, %1, %cst {dimension_numbers = #tpu.dot_dimension_numbers<[1], [0], [0], [1], [0, 0, 1, 1], [], []>} : vector<8x192xf32>, vector<192x32xf32>, vector<8x32xf32> -> vector<8x32xf32>
    %c0_3 = arith.constant 0 : index
    %c0_4 = arith.constant 0 : index
    %3 = vector.load %arg3[%c0_3, %c0_4] : memref<1x32xf32, #tpu.memory_space<vmem>>, vector<1x32xf32>
    %4 = vector.broadcast %3 : vector<1x32xf32> to vector<8x32xf32>
    %5 = arith.addf %2, %4 : vector<8x32xf32>
    %c0_5 = arith.constant 0 : index
    %c0_6 = arith.constant 0 : index
    %6 = vector.load %arg4[%c0_5, %c0_6] : memref<8x32xf32, #tpu.memory_space<vmem>>, vector<8x32xf32>
    tpu.vector_store %arg4[%c0_5, %c0_6], %5 {strides = array<i32>} : memref<8x32xf32, #tpu.memory_space<vmem>>, vector<8x32xf32>,
    return
  }
  func.func @transform_0(%arg0: i32) -> (i32, i32) {
    %c0_i32 = arith.constant 0 : i32
    %c0_i32_0 = arith.constant 0 : i32
    return %arg0, %c0_i32 : i32, i32
  }
  func.func @transform_1(%arg0: i32) -> (i32, i32) {
    %c0_i32 = arith.constant 0 : i32
    %c0_i32_0 = arith.constant 0 : i32
    %c0_i32_1 = arith.constant 0 : i32
    return %c0_i32, %c0_i32_0 : i32, i32
  }
  func.func @transform_2(%arg0: i32) -> (i32, i32) {
    %c0_i32 = arith.constant 0 : i32
    %c0_i32_0 = arith.constant 0 : i32
    %c0_i32_1 = arith.constant 0 : i32
    return %c0_i32, %c0_i32_0 : i32, i32
  }
  func.func @transform_3(%arg0: i32) -> (i32, i32) {
    %c0_i32 = arith.constant 0 : i32
    %c0_i32_0 = arith.constant 0 : i32
    return %arg0, %c0_i32 : i32, i32
  }
}

module attributes {stable_mosaic.version = 11 : i64} {
  func.func @_linear_res_kernel(%arg0: i32, %arg1: memref<10x32xf32, #tpu.memory_space<vmem>>, %arg2: memref<32x32xf32, #tpu.memory_space<vmem>>, %arg3: memref<1x32xf32, #tpu.memory_space<vmem>>, %arg4: memref<10x32xf32, #tpu.memory_space<vmem>>, %arg5: memref<10x32xf32, #tpu.memory_space<vmem>>) attributes {dimension_semantics = [#tpu.dimension_semantics<parallel>], iteration_bounds = array<i64: 1>, scalar_prefetch = 0 : i64, scratch_operands = 0 : i64, tpu.core_type = #tpu.core_type<tc>, window_params = [{transform_indices = @transform_0, window_bounds = array<i64: 10, 32>}, {pipeline_mode = #tpu.pipeline_mode<synchronous>, transform_indices = @transform_1, window_bounds = array<i64: 32, 32>}, {pipeline_mode = #tpu.pipeline_mode<synchronous>, transform_indices = @transform_2, window_bounds = array<i64: 1, 32>}, {transform_indices = @transform_3, window_bounds = array<i64: 10, 32>}, {transform_indices = @transform_4, window_bounds = array<i64: 10, 32>}]} {
    %c0 = arith.constant 0 : index
    %c0_0 = arith.constant 0 : index
    %0 = vector.load %arg1[%c0, %c0_0] : memref<10x32xf32, #tpu.memory_space<vmem>>, vector<10x32xf32>
    %c0_1 = arith.constant 0 : index
    %c0_2 = arith.constant 0 : index
    %1 = vector.load %arg2[%c0_1, %c0_2] : memref<32x32xf32, #tpu.memory_space<vmem>>, vector<32x32xf32>
    %cst = arith.constant dense<0.000000e+00> : vector<10x32xf32>
    %2 = tpu.matmul %0, %1, %cst {dimension_numbers = #tpu.dot_dimension_numbers<[1], [0], [0], [1], [0, 0, 1, 1], [], []>} : vector<10x32xf32>, vector<32x32xf32>, vector<10x32xf32> -> vector<10x32xf32>
    %c0_3 = arith.constant 0 : index
    %c0_4 = arith.constant 0 : index
    %3 = vector.load %arg3[%c0_3, %c0_4] : memref<1x32xf32, #tpu.memory_space<vmem>>, vector<1x32xf32>
    %4 = vector.broadcast %3 : vector<1x32xf32> to vector<10x32xf32>
    %5 = arith.addf %2, %4 : vector<10x32xf32>
    %c0_5 = arith.constant 0 : index
    %c0_6 = arith.constant 0 : index
    %6 = vector.load %arg4[%c0_5, %c0_6] : memref<10x32xf32, #tpu.memory_space<vmem>>, vector<10x32xf32>
    %7 = arith.addf %5, %6 : vector<10x32xf32>
    %c0_7 = arith.constant 0 : index
    %c0_8 = arith.constant 0 : index
    %8 = vector.load %arg5[%c0_7, %c0_8] : memref<10x32xf32, #tpu.memory_space<vmem>>, vector<10x32xf32>
    tpu.vector_store %arg5[%c0_7, %c0_8], %7 {strides = array<i32>} : memref<10x32xf32, #tpu.memory_space<vmem>>, vector<10x32xf32>,
    return
  }
  func.func @transform_0(%arg0: i32) -> (i32, i32) {
    %c0_i32 = arith.constant 0 : i32
    %c0_i32_0 = arith.constant 0 : i32
    return %arg0, %c0_i32 : i32, i32
  }
  func.func @transform_1(%arg0: i32) -> (i32, i32) {
    %c0_i32 = arith.constant 0 : i32
    %c0_i32_0 = arith.constant 0 : i32
    %c0_i32_1 = arith.constant 0 : i32
    return %c0_i32, %c0_i32_0 : i32, i32
  }
  func.func @transform_2(%arg0: i32) -> (i32, i32) {
    %c0_i32 = arith.constant 0 : i32
    %c0_i32_0 = arith.constant 0 : i32
    %c0_i32_1 = arith.constant 0 : i32
    return %c0_i32, %c0_i32_0 : i32, i32
  }
  func.func @transform_3(%arg0: i32) -> (i32, i32) {
    %c0_i32 = arith.constant 0 : i32
    %c0_i32_0 = arith.constant 0 : i32
    return %arg0, %c0_i32 : i32, i32
  }
  func.func @transform_4(%arg0: i32) -> (i32, i32) {
    %c0_i32 = arith.constant 0 : i32
    %c0_i32_0 = arith.constant 0 : i32
    return %arg0, %c0_i32 : i32, i32
  }
}

module attributes {stable_mosaic.version = 11 : i64} {
  func.func @_attention_kernel(%arg0: i32, %arg1: memref<1x5x96xf32, #tpu.memory_space<vmem>>, %arg2: memref<1x1x5xf32, #tpu.memory_space<vmem>>, %arg3: memref<1x5x32xf32, #tpu.memory_space<vmem>>) attributes {dimension_semantics = [#tpu.dimension_semantics<parallel>], iteration_bounds = array<i64: 2>, scalar_prefetch = 0 : i64, scratch_operands = 0 : i64, tpu.core_type = #tpu.core_type<tc>, window_params = [{transform_indices = @transform_0, window_bounds = array<i64: 1, 5, 96>}, {transform_indices = @transform_1, window_bounds = array<i64: 1, 1, 5>}, {transform_indices = @transform_2, window_bounds = array<i64: 1, 5, 32>}]} {
    %c0 = arith.constant 0 : index
    %c0_0 = arith.constant 0 : index
    %c0_1 = arith.constant 0 : index
    %0 = vector.load %arg1[%c0, %c0_0, %c0_1] : memref<1x5x96xf32, #tpu.memory_space<vmem>>, vector<1x5x96xf32>
    %1 = vector.shape_cast %0 : vector<1x5x96xf32> to vector<5x96xf32>
    %c0_2 = arith.constant 0 : index
    %c0_3 = arith.constant 0 : index
    %c0_4 = arith.constant 0 : index
    %2 = vector.load %arg2[%c0_2, %c0_3, %c0_4] : memref<1x1x5xf32, #tpu.memory_space<vmem>>, vector<1x1x5xf32>
    %3 = vector.shape_cast %2 : vector<1x1x5xf32> to vector<1x5xf32>
    %4 = vector.extract_strided_slice %1 {offsets = [0, 0], sizes = [5, 32], strides = [1, 1]} : vector<5x96xf32> to vector<5x32xf32>
    %5 = vector.extract_strided_slice %1 {offsets = [0, 32], sizes = [5, 32], strides = [1, 1]} : vector<5x96xf32> to vector<5x32xf32>
    %6 = vector.extract_strided_slice %1 {offsets = [0, 64], sizes = [5, 32], strides = [1, 1]} : vector<5x96xf32> to vector<5x32xf32>
    %7 = vector.extract_strided_slice %4 {offsets = [0, 0], sizes = [5, 8], strides = [1, 1]} : vector<5x32xf32> to vector<5x8xf32>
    %8 = vector.extract_strided_slice %5 {offsets = [0, 0], sizes = [5, 8], strides = [1, 1]} : vector<5x32xf32> to vector<5x8xf32>
    %9 = vector.extract_strided_slice %6 {offsets = [0, 0], sizes = [5, 8], strides = [1, 1]} : vector<5x32xf32> to vector<5x8xf32>
    %cst = arith.constant dense<0.000000e+00> : vector<5x5xf32>
    %10 = tpu.matmul %7, %8, %cst {dimension_numbers = #tpu.dot_dimension_numbers<[1], [1], [0], [0], [0, 0, 1, 0], [], []>} : vector<5x8xf32>, vector<5x8xf32>, vector<5x5xf32> -> vector<5x5xf32>
    %cst_5 = arith.constant 0.353553385 : f32
    %11 = vector.broadcast %cst_5 : f32 to vector<5x5xf32>
    %12 = arith.mulf %10, %11 : vector<5x5xf32>
    %13 = vector.broadcast %3 : vector<1x5xf32> to vector<5x5xf32>
    %14 = arith.addf %12, %13 : vector<5x5xf32>
    %cst_6 = arith.constant dense<0xFF800000> : vector<5xf32>
    %15 = vector.multi_reduction <maximumf>, %14, %cst_6 [1] : vector<5x5xf32> to vector<5xf32>
    %16 = vector.shape_cast %15 : vector<5xf32> to vector<5x1xf32>
    %17 = vector.broadcast %16 : vector<5x1xf32> to vector<5x5xf32>
    %18 = arith.subf %14, %17 : vector<5x5xf32>
    %19 = math.exp %18 : vector<5x5xf32>
    %cst_7 = arith.constant dense<0.000000e+00> : vector<5xf32>
    %20 = vector.multi_reduction <add>, %19, %cst_7 [1] : vector<5x5xf32> to vector<5xf32>
    %21 = vector.shape_cast %20 : vector<5xf32> to vector<5x1xf32>
    %22 = tpu.reciprocal %21 {approx = true} : vector<5x1xf32> -> vector<5x1xf32>
    %23 = vector.broadcast %22 : vector<5x1xf32> to vector<5x5xf32>
    %24 = arith.mulf %19, %23 : vector<5x5xf32>
    %cst_8 = arith.constant dense<0.000000e+00> : vector<5x8xf32>
    %25 = tpu.matmul %24, %9, %cst_8 {dimension_numbers = #tpu.dot_dimension_numbers<[1], [0], [0], [1], [0, 0, 1, 1], [], []>} : vector<5x5xf32>, vector<5x8xf32>, vector<5x8xf32> -> vector<5x8xf32>
    %26 = vector.extract_strided_slice %4 {offsets = [0, 8], sizes = [5, 8], strides = [1, 1]} : vector<5x32xf32> to vector<5x8xf32>
    %27 = vector.extract_strided_slice %5 {offsets = [0, 8], sizes = [5, 8], strides = [1, 1]} : vector<5x32xf32> to vector<5x8xf32>
    %28 = vector.extract_strided_slice %6 {offsets = [0, 8], sizes = [5, 8], strides = [1, 1]} : vector<5x32xf32> to vector<5x8xf32>
    %cst_9 = arith.constant dense<0.000000e+00> : vector<5x5xf32>
    %29 = tpu.matmul %26, %27, %cst_9 {dimension_numbers = #tpu.dot_dimension_numbers<[1], [1], [0], [0], [0, 0, 1, 0], [], []>} : vector<5x8xf32>, vector<5x8xf32>, vector<5x5xf32> -> vector<5x5xf32>
    %cst_10 = arith.constant 0.353553385 : f32
    %30 = vector.broadcast %cst_10 : f32 to vector<5x5xf32>
    %31 = arith.mulf %29, %30 : vector<5x5xf32>
    %32 = vector.broadcast %3 : vector<1x5xf32> to vector<5x5xf32>
    %33 = arith.addf %31, %32 : vector<5x5xf32>
    %cst_11 = arith.constant dense<0xFF800000> : vector<5xf32>
    %34 = vector.multi_reduction <maximumf>, %33, %cst_11 [1] : vector<5x5xf32> to vector<5xf32>
    %35 = vector.shape_cast %34 : vector<5xf32> to vector<5x1xf32>
    %36 = vector.broadcast %35 : vector<5x1xf32> to vector<5x5xf32>
    %37 = arith.subf %33, %36 : vector<5x5xf32>
    %38 = math.exp %37 : vector<5x5xf32>
    %cst_12 = arith.constant dense<0.000000e+00> : vector<5xf32>
    %39 = vector.multi_reduction <add>, %38, %cst_12 [1] : vector<5x5xf32> to vector<5xf32>
    %40 = vector.shape_cast %39 : vector<5xf32> to vector<5x1xf32>
    %41 = tpu.reciprocal %40 {approx = true} : vector<5x1xf32> -> vector<5x1xf32>
    %42 = vector.broadcast %41 : vector<5x1xf32> to vector<5x5xf32>
    %43 = arith.mulf %38, %42 : vector<5x5xf32>
    %cst_13 = arith.constant dense<0.000000e+00> : vector<5x8xf32>
    %44 = tpu.matmul %43, %28, %cst_13 {dimension_numbers = #tpu.dot_dimension_numbers<[1], [0], [0], [1], [0, 0, 1, 1], [], []>} : vector<5x5xf32>, vector<5x8xf32>, vector<5x8xf32> -> vector<5x8xf32>
    %45 = vector.extract_strided_slice %4 {offsets = [0, 16], sizes = [5, 8], strides = [1, 1]} : vector<5x32xf32> to vector<5x8xf32>
    %46 = vector.extract_strided_slice %5 {offsets = [0, 16], sizes = [5, 8], strides = [1, 1]} : vector<5x32xf32> to vector<5x8xf32>
    %47 = vector.extract_strided_slice %6 {offsets = [0, 16], sizes = [5, 8], strides = [1, 1]} : vector<5x32xf32> to vector<5x8xf32>
    %cst_14 = arith.constant dense<0.000000e+00> : vector<5x5xf32>
    %48 = tpu.matmul %45, %46, %cst_14 {dimension_numbers = #tpu.dot_dimension_numbers<[1], [1], [0], [0], [0, 0, 1, 0], [], []>} : vector<5x8xf32>, vector<5x8xf32>, vector<5x5xf32> -> vector<5x5xf32>
    %cst_15 = arith.constant 0.353553385 : f32
    %49 = vector.broadcast %cst_15 : f32 to vector<5x5xf32>
    %50 = arith.mulf %48, %49 : vector<5x5xf32>
    %51 = vector.broadcast %3 : vector<1x5xf32> to vector<5x5xf32>
    %52 = arith.addf %50, %51 : vector<5x5xf32>
    %cst_16 = arith.constant dense<0xFF800000> : vector<5xf32>
    %53 = vector.multi_reduction <maximumf>, %52, %cst_16 [1] : vector<5x5xf32> to vector<5xf32>
    %54 = vector.shape_cast %53 : vector<5xf32> to vector<5x1xf32>
    %55 = vector.broadcast %54 : vector<5x1xf32> to vector<5x5xf32>
    %56 = arith.subf %52, %55 : vector<5x5xf32>
    %57 = math.exp %56 : vector<5x5xf32>
    %cst_17 = arith.constant dense<0.000000e+00> : vector<5xf32>
    %58 = vector.multi_reduction <add>, %57, %cst_17 [1] : vector<5x5xf32> to vector<5xf32>
    %59 = vector.shape_cast %58 : vector<5xf32> to vector<5x1xf32>
    %60 = tpu.reciprocal %59 {approx = true} : vector<5x1xf32> -> vector<5x1xf32>
    %61 = vector.broadcast %60 : vector<5x1xf32> to vector<5x5xf32>
    %62 = arith.mulf %57, %61 : vector<5x5xf32>
    %cst_18 = arith.constant dense<0.000000e+00> : vector<5x8xf32>
    %63 = tpu.matmul %62, %47, %cst_18 {dimension_numbers = #tpu.dot_dimension_numbers<[1], [0], [0], [1], [0, 0, 1, 1], [], []>} : vector<5x5xf32>, vector<5x8xf32>, vector<5x8xf32> -> vector<5x8xf32>
    %64 = vector.extract_strided_slice %4 {offsets = [0, 24], sizes = [5, 8], strides = [1, 1]} : vector<5x32xf32> to vector<5x8xf32>
    %65 = vector.extract_strided_slice %5 {offsets = [0, 24], sizes = [5, 8], strides = [1, 1]} : vector<5x32xf32> to vector<5x8xf32>
    %66 = vector.extract_strided_slice %6 {offsets = [0, 24], sizes = [5, 8], strides = [1, 1]} : vector<5x32xf32> to vector<5x8xf32>
    %cst_19 = arith.constant dense<0.000000e+00> : vector<5x5xf32>
    %67 = tpu.matmul %64, %65, %cst_19 {dimension_numbers = #tpu.dot_dimension_numbers<[1], [1], [0], [0], [0, 0, 1, 0], [], []>} : vector<5x8xf32>, vector<5x8xf32>, vector<5x5xf32> -> vector<5x5xf32>
    %cst_20 = arith.constant 0.353553385 : f32
    %68 = vector.broadcast %cst_20 : f32 to vector<5x5xf32>
    %69 = arith.mulf %67, %68 : vector<5x5xf32>
    %70 = vector.broadcast %3 : vector<1x5xf32> to vector<5x5xf32>
    %71 = arith.addf %69, %70 : vector<5x5xf32>
    %cst_21 = arith.constant dense<0xFF800000> : vector<5xf32>
    %72 = vector.multi_reduction <maximumf>, %71, %cst_21 [1] : vector<5x5xf32> to vector<5xf32>
    %73 = vector.shape_cast %72 : vector<5xf32> to vector<5x1xf32>
    %74 = vector.broadcast %73 : vector<5x1xf32> to vector<5x5xf32>
    %75 = arith.subf %71, %74 : vector<5x5xf32>
    %76 = math.exp %75 : vector<5x5xf32>
    %cst_22 = arith.constant dense<0.000000e+00> : vector<5xf32>
    %77 = vector.multi_reduction <add>, %76, %cst_22 [1] : vector<5x5xf32> to vector<5xf32>
    %78 = vector.shape_cast %77 : vector<5xf32> to vector<5x1xf32>
    %79 = tpu.reciprocal %78 {approx = true} : vector<5x1xf32> -> vector<5x1xf32>
    %80 = vector.broadcast %79 : vector<5x1xf32> to vector<5x5xf32>
    %81 = arith.mulf %76, %80 : vector<5x5xf32>
    %cst_23 = arith.constant dense<0.000000e+00> : vector<5x8xf32>
    %82 = tpu.matmul %81, %66, %cst_23 {dimension_numbers = #tpu.dot_dimension_numbers<[1], [0], [0], [1], [0, 0, 1, 1], [], []>} : vector<5x5xf32>, vector<5x8xf32>, vector<5x8xf32> -> vector<5x8xf32>
    %83 = tpu.concatenate %25, %44, %63, %82 in 1 : vector<5x8xf32>, vector<5x8xf32>, vector<5x8xf32>, vector<5x8xf32> -> vector<5x32xf32>
    %c0_24 = arith.constant 0 : index
    %c0_25 = arith.constant 0 : index
    %c0_26 = arith.constant 0 : index
    %84 = vector.load %arg3[%c0_24, %c0_25, %c0_26] : memref<1x5x32xf32, #tpu.memory_space<vmem>>, vector<1x5x32xf32>
    %85 = vector.shape_cast %84 : vector<1x5x32xf32> to vector<5x32xf32>
    %86 = vector.shape_cast %83 : vector<5x32xf32> to vector<1x5x32xf32>
    tpu.vector_store %arg3[%c0_24, %c0_25, %c0_26], %86 {strides = array<i32>} : memref<1x5x32xf32, #tpu.memory_space<vmem>>, vector<1x5x32xf32>,
    return
  }
  func.func @transform_0(%arg0: i32) -> (i32, i32, i32) {
    %c0_i32 = arith.constant 0 : i32
    %c0_i32_0 = arith.constant 0 : i32
    %c0_i32_1 = arith.constant 0 : i32
    return %arg0, %c0_i32, %c0_i32_0 : i32, i32, i32
  }
  func.func @transform_1(%arg0: i32) -> (i32, i32, i32) {
    %c0_i32 = arith.constant 0 : i32
    %c0_i32_0 = arith.constant 0 : i32
    %c0_i32_1 = arith.constant 0 : i32
    return %arg0, %c0_i32, %c0_i32_0 : i32, i32, i32
  }
  func.func @transform_2(%arg0: i32) -> (i32, i32, i32) {
    %c0_i32 = arith.constant 0 : i32
    %c0_i32_0 = arith.constant 0 : i32
    %c0_i32_1 = arith.constant 0 : i32
    return %arg0, %c0_i32, %c0_i32_0 : i32, i32, i32
  }
}

module attributes {stable_mosaic.version = 11 : i64} {
  func.func @_layernorm_kernel(%arg0: i32, %arg1: memref<10x32xf32, #tpu.memory_space<vmem>>, %arg2: memref<1x32xf32, #tpu.memory_space<vmem>>, %arg3: memref<1x32xf32, #tpu.memory_space<vmem>>, %arg4: memref<10x32xf32, #tpu.memory_space<vmem>>) attributes {dimension_semantics = [#tpu.dimension_semantics<parallel>], iteration_bounds = array<i64: 1>, scalar_prefetch = 0 : i64, scratch_operands = 0 : i64, tpu.core_type = #tpu.core_type<tc>, window_params = [{transform_indices = @transform_0, window_bounds = array<i64: 10, 32>}, {pipeline_mode = #tpu.pipeline_mode<synchronous>, transform_indices = @transform_1, window_bounds = array<i64: 1, 32>}, {pipeline_mode = #tpu.pipeline_mode<synchronous>, transform_indices = @transform_2, window_bounds = array<i64: 1, 32>}, {transform_indices = @transform_3, window_bounds = array<i64: 10, 32>}]} {
    %c0 = arith.constant 0 : index
    %c0_0 = arith.constant 0 : index
    %0 = vector.load %arg1[%c0, %c0_0] : memref<10x32xf32, #tpu.memory_space<vmem>>, vector<10x32xf32>
    %cst = arith.constant dense<0.000000e+00> : vector<10xf32>
    %1 = vector.multi_reduction <add>, %0, %cst [1] : vector<10x32xf32> to vector<10xf32>
    %2 = vector.shape_cast %1 : vector<10xf32> to vector<10x1xf32>
    %cst_1 = arith.constant 3.200000e+01 : f32
    %3 = vector.broadcast %cst_1 : f32 to vector<10x1xf32>
    %4 = arith.divf %2, %3 : vector<10x1xf32>
    %5 = vector.broadcast %4 : vector<10x1xf32> to vector<10x32xf32>
    %6 = arith.subf %0, %5 : vector<10x32xf32>
    %7 = arith.mulf %6, %6 : vector<10x32xf32>
    %cst_2 = arith.constant dense<0.000000e+00> : vector<10xf32>
    %8 = vector.multi_reduction <add>, %7, %cst_2 [1] : vector<10x32xf32> to vector<10xf32>
    %9 = vector.shape_cast %8 : vector<10xf32> to vector<10x1xf32>
    %cst_3 = arith.constant 3.200000e+01 : f32
    %10 = vector.broadcast %cst_3 : f32 to vector<10x1xf32>
    %11 = arith.divf %9, %10 : vector<10x1xf32>
    %cst_4 = arith.constant 9.99999996E-13 : f32
    %12 = vector.broadcast %cst_4 : f32 to vector<10x1xf32>
    %13 = arith.addf %11, %12 : vector<10x1xf32>
    %14 = math.rsqrt %13 : vector<10x1xf32>
    %15 = vector.broadcast %14 : vector<10x1xf32> to vector<10x32xf32>
    %16 = arith.mulf %6, %15 : vector<10x32xf32>
    %c0_5 = arith.constant 0 : index
    %c0_6 = arith.constant 0 : index
    %17 = vector.load %arg2[%c0_5, %c0_6] : memref<1x32xf32, #tpu.memory_space<vmem>>, vector<1x32xf32>
    %18 = vector.broadcast %17 : vector<1x32xf32> to vector<10x32xf32>
    %19 = arith.mulf %16, %18 : vector<10x32xf32>
    %c0_7 = arith.constant 0 : index
    %c0_8 = arith.constant 0 : index
    %20 = vector.load %arg3[%c0_7, %c0_8] : memref<1x32xf32, #tpu.memory_space<vmem>>, vector<1x32xf32>
    %21 = vector.broadcast %20 : vector<1x32xf32> to vector<10x32xf32>
    %22 = arith.addf %19, %21 : vector<10x32xf32>
    %c0_9 = arith.constant 0 : index
    %c0_10 = arith.constant 0 : index
    %23 = vector.load %arg4[%c0_9, %c0_10] : memref<10x32xf32, #tpu.memory_space<vmem>>, vector<10x32xf32>
    tpu.vector_store %arg4[%c0_9, %c0_10], %22 {strides = array<i32>} : memref<10x32xf32, #tpu.memory_space<vmem>>, vector<10x32xf32>,
    return
  }
  func.func @transform_0(%arg0: i32) -> (i32, i32) {
    %c0_i32 = arith.constant 0 : i32
    %c0_i32_0 = arith.constant 0 : i32
    return %arg0, %c0_i32 : i32, i32
  }
  func.func @transform_1(%arg0: i32) -> (i32, i32) {
    %c0_i32 = arith.constant 0 : i32
    %c0_i32_0 = arith.constant 0 : i32
    %c0_i32_1 = arith.constant 0 : i32
    return %c0_i32, %c0_i32_0 : i32, i32
  }
  func.func @transform_2(%arg0: i32) -> (i32, i32) {
    %c0_i32 = arith.constant 0 : i32
    %c0_i32_0 = arith.constant 0 : i32
    %c0_i32_1 = arith.constant 0 : i32
    return %c0_i32, %c0_i32_0 : i32, i32
  }
  func.func @transform_3(%arg0: i32) -> (i32, i32) {
    %c0_i32 = arith.constant 0 : i32
    %c0_i32_0 = arith.constant 0 : i32
    return %arg0, %c0_i32 : i32, i32
  }
}

module attributes {stable_mosaic.version = 11 : i64} {
  func.func @_ln_mlp_kernel(%arg0: i32, %arg1: memref<10x32xf32, #tpu.memory_space<vmem>>, %arg2: memref<1x32xf32, #tpu.memory_space<vmem>>, %arg3: memref<1x32xf32, #tpu.memory_space<vmem>>, %arg4: memref<32x64xf32, #tpu.memory_space<vmem>>, %arg5: memref<1x64xf32, #tpu.memory_space<vmem>>, %arg6: memref<64x32xf32, #tpu.memory_space<vmem>>, %arg7: memref<1x32xf32, #tpu.memory_space<vmem>>, %arg8: memref<10x32xf32, #tpu.memory_space<vmem>>) attributes {dimension_semantics = [#tpu.dimension_semantics<parallel>], iteration_bounds = array<i64: 1>, scalar_prefetch = 0 : i64, scratch_operands = 0 : i64, tpu.core_type = #tpu.core_type<tc>, window_params = [{transform_indices = @transform_0, window_bounds = array<i64: 10, 32>}, {pipeline_mode = #tpu.pipeline_mode<synchronous>, transform_indices = @transform_1, window_bounds = array<i64: 1, 32>}, {pipeline_mode = #tpu.pipeline_mode<synchronous>, transform_indices = @transform_2, window_bounds = array<i64: 1, 32>}, {pipeline_mode = #tpu.pipeline_mode<synchronous>, transform_indices = @transform_3, window_bounds = array<i64: 32, 64>}, {pipeline_mode = #tpu.pipeline_mode<synchronous>, transform_indices = @transform_4, window_bounds = array<i64: 1, 64>}, {pipeline_mode = #tpu.pipeline_mode<synchronous>, transform_indices = @transform_5, window_bounds = array<i64: 64, 32>}, {pipeline_mode = #tpu.pipeline_mode<synchronous>, transform_indices = @transform_6, window_bounds = array<i64: 1, 32>}, {transform_indices = @transform_7, window_bounds = array<i64: 10, 32>}]} {
    %c0 = arith.constant 0 : index
    %c0_0 = arith.constant 0 : index
    %0 = vector.load %arg1[%c0, %c0_0] : memref<10x32xf32, #tpu.memory_space<vmem>>, vector<10x32xf32>
    %cst = arith.constant dense<0.000000e+00> : vector<10xf32>
    %1 = vector.multi_reduction <add>, %0, %cst [1] : vector<10x32xf32> to vector<10xf32>
    %2 = vector.shape_cast %1 : vector<10xf32> to vector<10x1xf32>
    %cst_1 = arith.constant 3.200000e+01 : f32
    %3 = vector.broadcast %cst_1 : f32 to vector<10x1xf32>
    %4 = arith.divf %2, %3 : vector<10x1xf32>
    %5 = vector.broadcast %4 : vector<10x1xf32> to vector<10x32xf32>
    %6 = arith.subf %0, %5 : vector<10x32xf32>
    %7 = arith.mulf %6, %6 : vector<10x32xf32>
    %cst_2 = arith.constant dense<0.000000e+00> : vector<10xf32>
    %8 = vector.multi_reduction <add>, %7, %cst_2 [1] : vector<10x32xf32> to vector<10xf32>
    %9 = vector.shape_cast %8 : vector<10xf32> to vector<10x1xf32>
    %cst_3 = arith.constant 3.200000e+01 : f32
    %10 = vector.broadcast %cst_3 : f32 to vector<10x1xf32>
    %11 = arith.divf %9, %10 : vector<10x1xf32>
    %cst_4 = arith.constant 9.99999996E-13 : f32
    %12 = vector.broadcast %cst_4 : f32 to vector<10x1xf32>
    %13 = arith.addf %11, %12 : vector<10x1xf32>
    %14 = math.rsqrt %13 : vector<10x1xf32>
    %15 = vector.broadcast %14 : vector<10x1xf32> to vector<10x32xf32>
    %16 = arith.mulf %6, %15 : vector<10x32xf32>
    %c0_5 = arith.constant 0 : index
    %c0_6 = arith.constant 0 : index
    %17 = vector.load %arg2[%c0_5, %c0_6] : memref<1x32xf32, #tpu.memory_space<vmem>>, vector<1x32xf32>
    %18 = vector.broadcast %17 : vector<1x32xf32> to vector<10x32xf32>
    %19 = arith.mulf %16, %18 : vector<10x32xf32>
    %c0_7 = arith.constant 0 : index
    %c0_8 = arith.constant 0 : index
    %20 = vector.load %arg3[%c0_7, %c0_8] : memref<1x32xf32, #tpu.memory_space<vmem>>, vector<1x32xf32>
    %21 = vector.broadcast %20 : vector<1x32xf32> to vector<10x32xf32>
    %22 = arith.addf %19, %21 : vector<10x32xf32>
    %c0_9 = arith.constant 0 : index
    %c0_10 = arith.constant 0 : index
    %23 = vector.load %arg4[%c0_9, %c0_10] : memref<32x64xf32, #tpu.memory_space<vmem>>, vector<32x64xf32>
    %cst_11 = arith.constant dense<0.000000e+00> : vector<10x64xf32>
    %24 = tpu.matmul %22, %23, %cst_11 {dimension_numbers = #tpu.dot_dimension_numbers<[1], [0], [0], [1], [0, 0, 1, 1], [], []>} : vector<10x32xf32>, vector<32x64xf32>, vector<10x64xf32> -> vector<10x64xf32>
    %c0_12 = arith.constant 0 : index
    %c0_13 = arith.constant 0 : index
    %25 = vector.load %arg5[%c0_12, %c0_13] : memref<1x64xf32, #tpu.memory_space<vmem>>, vector<1x64xf32>
    %26 = vector.broadcast %25 : vector<1x64xf32> to vector<10x64xf32>
    %27 = arith.addf %24, %26 : vector<10x64xf32>
    %cst_14 = arith.constant 5.000000e-01 : f32
    %28 = vector.broadcast %cst_14 : f32 to vector<10x64xf32>
    %29 = arith.mulf %28, %27 : vector<10x64xf32>
    %cst_15 = arith.constant 0.707106769 : f32
    %30 = vector.broadcast %cst_15 : f32 to vector<10x64xf32>
    %31 = arith.mulf %27, %30 : vector<10x64xf32>
    %32 = math.erf %31 : vector<10x64xf32>
    %cst_16 = arith.constant 1.000000e+00 : f32
    %33 = vector.broadcast %cst_16 : f32 to vector<10x64xf32>
    %34 = arith.addf %33, %32 : vector<10x64xf32>
    %35 = arith.mulf %29, %34 : vector<10x64xf32>
    %c0_17 = arith.constant 0 : index
    %c0_18 = arith.constant 0 : index
    %36 = vector.load %arg6[%c0_17, %c0_18] : memref<64x32xf32, #tpu.memory_space<vmem>>, vector<64x32xf32>
    %cst_19 = arith.constant dense<0.000000e+00> : vector<10x32xf32>
    %37 = tpu.matmul %35, %36, %cst_19 {dimension_numbers = #tpu.dot_dimension_numbers<[1], [0], [0], [1], [0, 0, 1, 1], [], []>} : vector<10x64xf32>, vector<64x32xf32>, vector<10x32xf32> -> vector<10x32xf32>
    %c0_20 = arith.constant 0 : index
    %c0_21 = arith.constant 0 : index
    %38 = vector.load %arg7[%c0_20, %c0_21] : memref<1x32xf32, #tpu.memory_space<vmem>>, vector<1x32xf32>
    %39 = vector.broadcast %38 : vector<1x32xf32> to vector<10x32xf32>
    %40 = arith.addf %37, %39 : vector<10x32xf32>
    %41 = arith.addf %40, %0 : vector<10x32xf32>
    %c0_22 = arith.constant 0 : index
    %c0_23 = arith.constant 0 : index
    %42 = vector.load %arg8[%c0_22, %c0_23] : memref<10x32xf32, #tpu.memory_space<vmem>>, vector<10x32xf32>
    tpu.vector_store %arg8[%c0_22, %c0_23], %41 {strides = array<i32>} : memref<10x32xf32, #tpu.memory_space<vmem>>, vector<10x32xf32>,
    return
  }
  func.func @transform_0(%arg0: i32) -> (i32, i32) {
    %c0_i32 = arith.constant 0 : i32
    %c0_i32_0 = arith.constant 0 : i32
    return %arg0, %c0_i32 : i32, i32
  }
  func.func @transform_1(%arg0: i32) -> (i32, i32) {
    %c0_i32 = arith.constant 0 : i32
    %c0_i32_0 = arith.constant 0 : i32
    %c0_i32_1 = arith.constant 0 : i32
    return %c0_i32, %c0_i32_0 : i32, i32
  }
  func.func @transform_2(%arg0: i32) -> (i32, i32) {
    %c0_i32 = arith.constant 0 : i32
    %c0_i32_0 = arith.constant 0 : i32
    %c0_i32_1 = arith.constant 0 : i32
    return %c0_i32, %c0_i32_0 : i32, i32
  }
  func.func @transform_3(%arg0: i32) -> (i32, i32) {
    %c0_i32 = arith.constant 0 : i32
    %c0_i32_0 = arith.constant 0 : i32
    %c0_i32_1 = arith.constant 0 : i32
    return %c0_i32, %c0_i32_0 : i32, i32
  }
  func.func @transform_4(%arg0: i32) -> (i32, i32) {
    %c0_i32 = arith.constant 0 : i32
    %c0_i32_0 = arith.constant 0 : i32
    %c0_i32_1 = arith.constant 0 : i32
    return %c0_i32, %c0_i32_0 : i32, i32
  }
  func.func @transform_5(%arg0: i32) -> (i32, i32) {
    %c0_i32 = arith.constant 0 : i32
    %c0_i32_0 = arith.constant 0 : i32
    %c0_i32_1 = arith.constant 0 : i32
    return %c0_i32, %c0_i32_0 : i32, i32
  }
  func.func @transform_6(%arg0: i32) -> (i32, i32) {
    %c0_i32 = arith.constant 0 : i32
    %c0_i32_0 = arith.constant 0 : i32
    %c0_i32_1 = arith.constant 0 : i32
    return %c0_i32, %c0_i32_0 : i32, i32
  }
  func.func @transform_7(%arg0: i32) -> (i32, i32) {
    %c0_i32 = arith.constant 0 : i32
    %c0_i32_0 = arith.constant 0 : i32
    return %arg0, %c0_i32 : i32, i32
  }
}

module attributes {stable_mosaic.version = 11 : i64} {
  func.func @_linear_kernel(%arg0: i32, %arg1: memref<10x32xf32, #tpu.memory_space<vmem>>, %arg2: memref<32x32xf32, #tpu.memory_space<vmem>>, %arg3: memref<1x32xf32, #tpu.memory_space<vmem>>, %arg4: memref<10x32xf32, #tpu.memory_space<vmem>>) attributes {dimension_semantics = [#tpu.dimension_semantics<parallel>], iteration_bounds = array<i64: 1>, scalar_prefetch = 0 : i64, scratch_operands = 0 : i64, tpu.core_type = #tpu.core_type<tc>, window_params = [{transform_indices = @transform_0, window_bounds = array<i64: 10, 32>}, {pipeline_mode = #tpu.pipeline_mode<synchronous>, transform_indices = @transform_1, window_bounds = array<i64: 32, 32>}, {pipeline_mode = #tpu.pipeline_mode<synchronous>, transform_indices = @transform_2, window_bounds = array<i64: 1, 32>}, {transform_indices = @transform_3, window_bounds = array<i64: 10, 32>}]} {
    %c0 = arith.constant 0 : index
    %c0_0 = arith.constant 0 : index
    %0 = vector.load %arg1[%c0, %c0_0] : memref<10x32xf32, #tpu.memory_space<vmem>>, vector<10x32xf32>
    %c0_1 = arith.constant 0 : index
    %c0_2 = arith.constant 0 : index
    %1 = vector.load %arg2[%c0_1, %c0_2] : memref<32x32xf32, #tpu.memory_space<vmem>>, vector<32x32xf32>
    %cst = arith.constant dense<0.000000e+00> : vector<10x32xf32>
    %2 = tpu.matmul %0, %1, %cst {dimension_numbers = #tpu.dot_dimension_numbers<[1], [0], [0], [1], [0, 0, 1, 1], [], []>} : vector<10x32xf32>, vector<32x32xf32>, vector<10x32xf32> -> vector<10x32xf32>
    %c0_3 = arith.constant 0 : index
    %c0_4 = arith.constant 0 : index
    %3 = vector.load %arg3[%c0_3, %c0_4] : memref<1x32xf32, #tpu.memory_space<vmem>>, vector<1x32xf32>
    %4 = vector.broadcast %3 : vector<1x32xf32> to vector<10x32xf32>
    %5 = arith.addf %2, %4 : vector<10x32xf32>
    %cst_5 = arith.constant 5.000000e-01 : f32
    %6 = vector.broadcast %cst_5 : f32 to vector<10x32xf32>
    %7 = arith.mulf %6, %5 : vector<10x32xf32>
    %cst_6 = arith.constant 0.707106769 : f32
    %8 = vector.broadcast %cst_6 : f32 to vector<10x32xf32>
    %9 = arith.mulf %5, %8 : vector<10x32xf32>
    %10 = math.erf %9 : vector<10x32xf32>
    %cst_7 = arith.constant 1.000000e+00 : f32
    %11 = vector.broadcast %cst_7 : f32 to vector<10x32xf32>
    %12 = arith.addf %11, %10 : vector<10x32xf32>
    %13 = arith.mulf %7, %12 : vector<10x32xf32>
    %c0_8 = arith.constant 0 : index
    %c0_9 = arith.constant 0 : index
    %14 = vector.load %arg4[%c0_8, %c0_9] : memref<10x32xf32, #tpu.memory_space<vmem>>, vector<10x32xf32>
    tpu.vector_store %arg4[%c0_8, %c0_9], %13 {strides = array<i32>} : memref<10x32xf32, #tpu.memory_space<vmem>>, vector<10x32xf32>,
    return
  }
  func.func @transform_0(%arg0: i32) -> (i32, i32) {
    %c0_i32 = arith.constant 0 : i32
    %c0_i32_0 = arith.constant 0 : i32
    return %arg0, %c0_i32 : i32, i32
  }
  func.func @transform_1(%arg0: i32) -> (i32, i32) {
    %c0_i32 = arith.constant 0 : i32
    %c0_i32_0 = arith.constant 0 : i32
    %c0_i32_1 = arith.constant 0 : i32
    return %c0_i32, %c0_i32_0 : i32, i32
  }
  func.func @transform_2(%arg0: i32) -> (i32, i32) {
    %c0_i32 = arith.constant 0 : i32
    %c0_i32_0 = arith.constant 0 : i32
    %c0_i32_1 = arith.constant 0 : i32
    return %c0_i32, %c0_i32_0 : i32, i32
  }
  func.func @transform_3(%arg0: i32) -> (i32, i32) {
    %c0_i32 = arith.constant 0 : i32
    %c0_i32_0 = arith.constant 0 : i32
    return %arg0, %c0_i32 : i32, i32
  }
}

</mosaic_0001>

<bundles_post_ra>
// kernel: forward.35
= control target key start
LH: loop header
LB: loop body
LE: loop exit
PB: predicated region body
PF: predicated region fallthrough
CT: control target
= control target key end

     0   :  { %vm27_vm0 = vcmask 261120   ;;  %vm62_vm1 = vcmask 254976   ;;  %s136_s1 = inlined_call_operand.vmem [shape: f32[32,32], index: 1, kind: input, shape index: {}]   ;;  %s137_s2 = inlined_call_operand.vmem [shape: f32[1,32], index: 2, kind: input, shape index: {}]   ;;  %s138_s0 = inlined_call_operand.vmem [shape: f32[10,32], index: 0, kind: input, shape index: {}]   ;;  %s139_s3 = inlined_call_operand.vmem [shape: f32[10,32], index: 3, kind: input, shape index: {}]   ;;  %s140_s4 = inlined_call_operand.vmem [shape: f32[10,32], index: 4, kind: output, shape index: {}]  }
   0x1   :  { %v22_v0 = vld [vmem:[%s136_s1 + $0x18] sm:$0xff]  ;;  %v21_v1 = vld [vmem:[%s136_s1 + $0x10] sm:$0xff]  ;;  %v20_v2 = vld [vmem:[%s136_s1 + $0x8] sm:$0xff] }
   0x2   :  { %46 = vmatpush.msra.mxu0 %v22_v0  ;;  %70 = vmatpush.msra.mxu1 %v22_v0  ;;  %v19_v3 = vld [vmem:[%s136_s1] sm:$0xff]  ;;  %v18_v5 = vld [vmem:[%s138_s0 + $0x8] sm:$0x3] }
   0x3   :  { %v17_v4 = vld [vmem:[%s138_s0] sm:$0xff]  ;;  %v58_v10 = vld [vmem:[%s139_s3 + $0x8] sm:$0x3] }
   0x4   :  { %47 = vmatpush.msra.mxu0 %v21_v1  ;;  %71 = vmatpush.msra.mxu1 %v21_v1  ;;  %v74_v6 = vld [vmem:[%s137_s2] ss:$0 sm:$0xff] }
   0x5   :  { %v57_v8 = vld [vmem:[%s139_s3] sm:$0xff] }
   0x6   :  { %48 = vmatpush.msra.mxu0 %v20_v2  ;;  %72 = vmatpush.msra.mxu1 %v20_v2 }
   0x8   :  { %49 = vmatpush.msra.mxu0 %v19_v3  ;;  %73 = vmatpush.msra.mxu1 %v19_v3 }
   0x9   :  { %68 = vmatmul.msk.f32.vlgmr.msra.gmra.mxu0 %vm27_vm0, %v17_v4  ;;  %69 = vmatmul.msk.f32.vlgmr.msra.gmra.mxu1 %vm27_vm0, %v18_v5 }
  0x86   :  { %v51_v7 = vpop.f32.mrf.mxu0  ;;  %v54_v9 = vpop.f32.mrf.mxu1 }
  0x87   :  { %v52_v11 = vadd.f32 %v74_v6, %v51_v7  ;;  %v55_v12 = vadd.f32 %v74_v6, %v54_v9 }
  0x89   :  { %v59_v13 = vadd.f32 %v57_v8, %v52_v11  ;;  %v60_v14 = vadd.f32 %v58_v10, %v55_v12 }
  0x8b   :  { %61 = vst.msk [vmem:[%s140_s4] sm:$0xff] %vm27_vm0, %v59_v13 }
  0x8c   :  { %63 = vst.msk [vmem:[%s140_s4 + $0x8] sm:$0x3] %vm62_vm1, %v60_v14 }

// kernel: forward.32
= control target key start
LH: loop header
LB: loop body
LE: loop exit
PB: predicated region body
PF: predicated region fallthrough
CT: control target
= control target key end

     0   :  { %vm44_vm0 = vcmask 523264   ;;  %vm88_vm1 = vcmask 261120   ;;  %s200_s1 = inlined_call_operand.vmem [shape: f32[192,32], index: 1, kind: input, shape index: {}]   ;;  %s201_s2 = inlined_call_operand.vmem [shape: f32[1,32], index: 2, kind: input, shape index: {}]   ;;  %s202_s0 = inlined_call_operand.vmem [shape: f32[8,192], index: 0, kind: input, shape index: {}]   ;;  %s203_s3 = inlined_call_operand.vmem [shape: f32[8,32], index: 3, kind: output, shape index: {}]  }
   0x1   :  { %v31_v0 = vld [vmem:[%s200_s1 + $0x78] sm:$0xff]  ;;  %v30_v1 = vld [vmem:[%s200_s1 + $0x70] sm:$0xff]  ;;  %v29_v2 = vld [vmem:[%s200_s1 + $0x68] sm:$0xff] }
   0x2   :  { %48 = vmatpush.msra.mxu0 %v31_v0  ;;  %v39_v3 = vld [vmem:[%s200_s1 + $0xb8] sm:$0xff]  ;;  %v28_v4 = vld [vmem:[%s200_s1 + $0x60] sm:$0xff]  ;;  %v38_v5 = vld [vmem:[%s200_s1 + $0xb0] sm:$0xff] }
   0x3   :  { %76 = vmatpush.msra.mxu1 %v39_v3  ;;  %v37_v6 = vld [vmem:[%s200_s1 + $0xa8] sm:$0xff]  ;;  %v27_v7 = vld [vmem:[%s200_s1 + $0x58] sm:$0xff]  ;;  %v36_v8 = vld [vmem:[%s200_s1 + $0xa0] sm:$0xff] }
   0x4   :  { %49 = vmatpush.msra.mxu0 %v30_v1  ;;  %v26_v9 = vld [vmem:[%s200_s1 + $0x50] sm:$0xff]  ;;  %v35_v10 = vld [vmem:[%s200_s1 + $0x98] sm:$0xff]  ;;  %v25_v11 = vld [vmem:[%s200_s1 + $0x48] sm:$0xff] }
   0x5   :  { %77 = vmatpush.msra.mxu1 %v38_v5  ;;  %v34_v12 = vld [vmem:[%s200_s1 + $0x90] sm:$0xff]  ;;  %v24_v13 = vld [vmem:[%s200_s1 + $0x40] sm:$0xff]  ;;  %v33_v14 = vld [vmem:[%s200_s1 + $0x88] sm:$0xff] }
   0x6   :  { %50 = vmatpush.msra.mxu0 %v29_v2  ;;  %v23_v15 = vld [vmem:[%s200_s1 + $0x38] sm:$0xff]  ;;  %v32_v16 = vld [vmem:[%s200_s1 + $0x80] sm:$0xff]  ;;  %v22_v17 = vld [vmem:[%s200_s1 + $0x30] sm:$0xff] }
   0x7   :  { %78 = vmatpush.msra.mxu1 %v37_v6  ;;  %v15_v18 = vld [vmem:[%s202_s0 + $0x8] sm:$0xff]  ;;  %v20_v20 = vld [vmem:[%s200_s1 + $0x20] sm:$0xff]  ;;  %v19_v21 = vld [vmem:[%s200_s1 + $0x18] sm:$0xff] }
   0x8   :  { %51 = vmatpush.msra.mxu0 %v28_v4  ;;  %v21_v19 = vld [vmem:[%s200_s1 + $0x28] sm:$0xff]  ;;  %v18_v22 = vld [vmem:[%s200_s1 + $0x10] sm:$0xff]  ;;  %v16_v24 = vld [vmem:[%s200_s1] sm:$0xff] }
   0x9   :  { %79 = vmatpush.msra.mxu1 %v36_v8  ;;  %v17_v23 = vld [vmem:[%s200_s1 + $0x8] sm:$0xff]  ;;  %v14_v25 = vld [vmem:[%s202_s0] sm:$0xff] }
   0xa   :  { %52 = vmatpush.msra.mxu0 %v27_v7  ;;  %v95_v26 = vld [vmem:[%s201_s2] ss:$0 sm:$0xff] }
   0xb   :  { %80 = vmatpush.msra.mxu1 %v35_v10 }
   0xc   :  { %53 = vmatpush.msra.mxu0 %v26_v9 }
   0xd   :  { %81 = vmatpush.msra.mxu1 %v34_v12 }
   0xe   :  { %54 = vmatpush.msra.mxu0 %v25_v11 }
   0xf   :  { %82 = vmatpush.msra.mxu1 %v33_v14 }
  0x10   :  { %55 = vmatpush.msra.mxu0 %v24_v13 }
  0x11   :  { %83 = vmatpush.msra.mxu1 %v32_v16 }
  0x12   :  { %56 = vmatpush.msra.mxu0 %v23_v15  ;;  %94 = vmatmul.msk.f32.vlgmr.msra.gmra.mxu1 %vm44_vm0, %v15_v18 }
  0x14   :  { %57 = vmatpush.msra.mxu0 %v22_v17 }
  0x16   :  { %58 = vmatpush.msra.mxu0 %v21_v19 }
  0x18   :  { %59 = vmatpush.msra.mxu0 %v20_v20 }
  0x1a   :  { %60 = vmatpush.msra.mxu0 %v19_v21 }
  0x1c   :  { %61 = vmatpush.msra.mxu0 %v18_v22 }
  0x1e   :  { %62 = vmatpush.msra.mxu0 %v17_v23 }
  0x20   :  { %63 = vmatpush.msra.mxu0 %v16_v24 }
  0x21   :  { %64 = vmatmul.f32.vlgmr.msra.gmra.mxu0 %v14_v25 }
  0x8f   :  { %v85_v28 = vpop.f32.mrf.mxu1 }
  0x9e   :  { %v65_v27 = vpop.f32.mrf.mxu0 }
  0x9f   :  { %v66_v29 = vadd.f32 %v95_v26, %v65_v27 }
  0xa1   :  { %v86_v30 = vadd.f32 %v85_v28, %v66_v29 }
  0xa3   :  { %89 = vst.msk [vmem:[%s203_s3] sm:$0xff] %vm88_vm1, %v86_v30 }

// kernel: forward.33
= control target key start
LH: loop header
LB: loop body
LE: loop exit
PB: predicated region body
PF: predicated region fallthrough
CT: control target
= control target key end

     0   :  { %vm22_vm0 = vcmask 261120   ;;  %vm26_vm1 = vcmask 254976   ;;  %v148_v4 = vmov 32.0   ;;  %vm124_vm9 = vcmask 785408   ;;  %s218_s0 = inlined_call_operand.vmem [shape: f32[10,32], index: 0, kind: input, shape index: {}]   ;;  %s219_s1 = inlined_call_operand.vmem [shape: f32[1,32], index: 1, kind: input, shape index: {}]   ;;  %s220_s2 = inlined_call_operand.vmem [shape: f32[1,32], index: 2, kind: input, shape index: {}]   ;;  %s221_s4 = inlined_call_operand.vmem [shape: f32[1,96], index: 4, kind: input, shape index: {}]   ;;  %s222_s3 = inlined_call_operand.vmem [shape: f32[32,96], index: 3, kind: input, shape index: {}]   ;;  %s223_s5 = inlined_call_operand.vmem [shape: f32[10,96], index: 5, kind: output, shape index: {}]  }
   0x1   :  { %v20_v0 = vld [vmem:[%s218_s0] sm:$0xff]  ;;  %v21_v2 = vld [vmem:[%s218_s0 + $0x8] sm:$0x3]  ;;  %142 = vrcp.f32 %v148_v4  ;;  %v90_v21 = vld [vmem:[%s222_s3 + $0x18] sm:$0xff]  ;;  %vm126_vm10 = vcmask 779264  }
   0x2   :  { %v23_v1 = vsel %vm22_vm0, %v20_v0, 0.0  ;;  %v27_v3 = vsel %vm26_vm1, %v21_v2, 0.0  ;;  %113 = vmatpush.msra.mxu0 %v90_v21  ;;  %134 = vmatpush.msra.mxu1 %v90_v21  ;;  %v89_v22 = vld [vmem:[%s222_s3 + $0x10] sm:$0xff]  ;;  %v88_v23 = vld [vmem:[%s222_s3 + $0x8] sm:$0xff]  ;;  %v87_v24 = vld [vmem:[%s222_s3] sm:$0xff] }
   0x3   :  { %24 = vadd.xlane.f32.xlu0 %v23_v1  ;;  %v139_v39 = vld [vmem:[%s219_s1] ss:$0 sm:$0xff] }
   0x4   :  { %114 = vmatpush.msra.mxu0 %v89_v22  ;;  %135 = vmatpush.msra.mxu1 %v89_v22  ;;  %v140_v43 = vld [vmem:[%s220_s2] ss:$0 sm:$0xff] }
   0x5   :  { %v141_v53 = vld [vmem:[%s221_s4] ss:$0 sm:$0xff] }
   0x6   :  { %115 = vmatpush.msra.mxu0 %v88_v23  ;;  %136 = vmatpush.msra.mxu1 %v88_v23 }
   0x7   :  { %v143_v5 = vpop.eup %142 }
   0x8   :  { %v31_v6 = vmul.f32 32.0, %v143_v5  ;;  %vm35_vm2 = vweird.f32 %v143_v5  ;;  %116 = vmatpush.msra.mxu0 %v87_v24  ;;  %137 = vmatpush.msra.mxu1 %v87_v24 }
   0xa   :  { %v32_v7 = vsub.f32 1.0, %v31_v6 }
   0xb   :  { %28 = vadd.xlane.f32.xlu0 %v27_v3 }
   0xc   :  { %v33_v8 = vmul.f32 %v143_v5, %v32_v7 }
   0xe   :  { %v34_v9 = vadd.f32 %v143_v5, %v33_v8 }
  0x10   :  { %v36_v10 = vsel %vm35_vm2, %v143_v5, %v34_v9 }
  0x76   :  { %v25_v11 = vpop.xlane.xlu0 %24 }
  0x77   :  { %v37_v12 = vmul.f32 %v36_v10, %v25_v11 }
  0x79   :  { %v39_v13 = vsub.f32 %v20_v0, %v37_v12 }
  0x7b   :  { %v41_v14 = vmul.f32 %v39_v13, %v39_v13 }
  0x7d   :  { %v43_v15 = vsel %vm22_vm0, %v41_v14, 0.0 }
  0x7e   :  { %44 = vadd.xlane.f32.xlu1 %v43_v15  ;;  %v29_v16 = vpop.xlane.xlu0 %28 }
  0x7f   :  { %v38_v17 = vmul.f32 %v36_v10, %v29_v16 }
  0x81   :  { %v40_v18 = vsub.f32 %v21_v2, %v38_v17 }
  0x83   :  { %v42_v19 = vmul.f32 %v40_v18, %v40_v18 }
  0x85   :  { %v46_v20 = vsel %vm26_vm1, %v42_v19, 0.0 }
  0x86   :  { %47 = vadd.xlane.f32.xlu1 %v46_v20 }
  0xf1   :  { %v45_v25 = vpop.xlane.xlu1 %44 }
  0xf2   :  { %v49_v26 = vmul.f32 %v45_v25, %v36_v10 }
  0xf4   :  { %v51_v27 = vadd.f32 1e-12, %v49_v26 }
  0xf6   :  { %144 = vrsqrt.f32 %v51_v27  ;;  %vm59_vm4 = vweird.f32 %v51_v27 }
  0xf9   :  { %v48_v28 = vpop.xlane.xlu1 %47 }
  0xfa   :  { %v50_v29 = vmul.f32 %v48_v28, %v36_v10 }
  0xfc   :  { %v145_v30 = vpop.eup %144  ;;  %v52_v31 = vadd.f32 1e-12, %v50_v29 }
  0xfd   :  { %v54_v32 = vmul.f32 %v145_v30, %v51_v27  ;;  %vm60_vm3 = vweird.f32 %v145_v30 }
  0xfe   :  { %146 = vrsqrt.f32 %v52_v31  ;;  %vm61_vm5 = vmor %vm59_vm4, %vm60_vm3  ;;  %vm69_vm7 = vweird.f32 %v52_v31 }
  0xff   :  { %v55_v33 = vmul.f32 %v145_v30, %v54_v32 }
 0x101   :  { %v56_v34 = vmul.f32 0.5, %v55_v33 }
 0x103   :  { %v57_v35 = vsub.f32 1.5, %v56_v34 }
 0x104   :  { %v147_v36 = vpop.eup %146 }
 0x105   :  { %v58_v37 = vmul.f32 %v145_v30, %v57_v35  ;;  %v64_v38 = vmul.f32 %v147_v36, %v52_v31  ;;  %vm70_vm6 = vweird.f32 %v147_v36 }
 0x106   :  { %vm71_vm8 = vmor %vm69_vm7, %vm70_vm6 }
 0x107   :  { %v62_v40 = vsel %vm61_vm5, %v145_v30, %v58_v37  ;;  %v65_v41 = vmul.f32 %v147_v36, %v64_v38 }
 0x108   :  { %v73_v42 = vmul.f32 %v62_v40, %v39_v13 }
 0x109   :  { %v66_v44 = vmul.f32 0.5, %v65_v41 }
 0x10a   :  { %v79_v45 = vmul.f32 %v139_v39, %v73_v42 }
 0x10b   :  { %v67_v46 = vsub.f32 1.5, %v66_v44 }
 0x10c   :  { %v85_v47 = vadd.f32 %v140_v43, %v79_v45 }
 0x10d   :  { %v68_v48 = vmul.f32 %v147_v36, %v67_v46 }
 0x10e   :  { %132 = vmatmul.msk.f32.vlgmr.msra.gmra.mxu0 %vm22_vm0, %v85_v47 }
 0x10f   :  { %v72_v49 = vsel %vm71_vm8, %v147_v36, %v68_v48 }
 0x110   :  { %v74_v50 = vmul.f32 %v72_v49, %v40_v18 }
 0x112   :  { %v80_v51 = vmul.f32 %v139_v39, %v74_v50 }
 0x114   :  { %v86_v52 = vadd.f32 %v140_v43, %v80_v51 }
 0x116   :  { %133 = vmatmul.msk.f32.vlgmr.msra.gmra.mxu1 %vm22_vm0, %v86_v52 }
 0x18b   :  { %v118_v54 = vpop.f32.mrf.mxu0 }
 0x18c   :  { %v119_v55 = vadd.f32 %v141_v53, %v118_v54 }
 0x18e   :  { %125 = vst.msk [vmem:[%s223_s5] sm:$0xff] %vm124_vm9, %v119_v55 }
 0x193   :  { %v121_v56 = vpop.f32.mrf.mxu1 }
 0x194   :  { %v122_v57 = vadd.f32 %v141_v53, %v121_v56 }
 0x196   :  { %127 = vst.msk [vmem:[%s223_s5 + $0x8] sm:$0x3] %vm126_vm10, %v122_v57 }

// kernel: forward.34
= control target key start
LH: loop header
LB: loop body
LE: loop exit
PB: predicated region body
PF: predicated region fallthrough
CT: control target
= control target key end

     0   :  { %s615_s9 = smov 0   ;;  %s685_s0 = inlined_call_operand.vmem [shape: f32[2,5,96], index: 0, kind: input, shape index: {}]   ;;  %s686_s1 = inlined_call_operand.vmem [shape: f32[2,1,5], index: 1, kind: input, shape index: {}]   ;;  %s687_s2 = inlined_call_operand.vmem [shape: f32[2,5,32], index: 2, kind: output, shape index: {}]  }
   0x1 LB: > { %s514_s10 = sadd.s32 4294967295, %s584_s9   ;;  %p518_p0 = scmp.ge.s32.totalorder %s584_s9, 1  ;;  %s584_s9 = sphi %s615_s9, %s12_s9  }
   0x2   : > { %p119_p1 = scmp.lt.s32.totalorder %s584_s9, 3 }
   0x4   : > { %p120_p2 = pnand %p518_p0, %p119_p1 }
   0x5   : > { %p142_p3 = scmp.lt.s32.totalorder (!%p120_p2), %s514_s10, 1  ;;  %s586_s15 = smov (!%p120_p2), 96  }
   0x6   : > { %123 = sbr.rel (%p120_p2) target bundleno = 1178 (0x49a), region = 28  ;;  %s587_s16 = smov (!%p120_p2), 88  }
   0x7   : > { %s588_s20 = smov (!%p120_p2), 120   ;;  %s589_s21 = smov (!%p120_p2), 64  }
   0x8   : > { %s590_s22 = smov (!%p120_p2), 80   ;;  %s591_s23 = smov (!%p120_p2), 72  }
   0x9   : > { %s592_s24 = smov (!%p120_p2), 112   ;;  %s593_s25 = smov (!%p120_p2), 104  }
   0xa   : > { %s594_s26 = smov (!%p120_p2), 48   ;;  %s595_s27 = smov (!%p120_p2), 56  }
   0xb   : > { %s689_s10 = smov (!%p142_p3, %s514_s10), 1  ;;  %vm158_vm0 = vcmask 64512   ;;  %vm188_vm1 = vcmask 36864   ;;  %vm206_vm2 = vcmask 1044480   ;;  %vm202_vm3 = vcmask 39936   ;;  %s596_s28 = smov 40  }
   0xc   : > { %s519_s11 = sshll.u32 %s689_s10, 3  ;;  %s148_s19 = scalar_lea.vmem %s686_s1, %s689_s10  ;;  %vm446_vm4 = vcmask 130048   ;;  %vm448_vm5 = vcmask 195584   ;;  %vm450_vm6 = vcmask 258048  }
   0xd   : > { %s145_s14 = scalar_lea.vmem %s685_s0, %s519_s11  ;;  %v561_v4 = vld [vmem:[%s148_s19] ss:$0 sm:$0xff]  ;;  %s597_s29 = smov 24  }
   0xe   : > { %v631_v0 = vld [vmem:[%s145_s14] sm:$0x1f]  ;;  %s598_s30 = smov 8   ;;  %s599_s3 = smov 16  }
   0xf   : > { %156 = vrot.lane.b32.xlu0 %v631_v0, %s586_s15  ;;  %231 = vrot.lane.b32.xlu1 %v631_v0, %s587_s16  ;;  %s152_s6 = scalar_lea.vmem %s687_s2, %s519_s11 }
  0x10   : > { %229 = vrot.lane.b32.xlu2 %v631_v0, %s588_s20 }
  0x18   : > { %200 = vrot.lane.b32.xlu2 %v631_v0, %s589_s21 }
  0x20   : > { %299 = vrot.lane.b32.xlu2 %v631_v0, %s590_s22 }
  0x28   : > { %367 = vrot.lane.b32.xlu2 %v631_v0, %s591_s23 }
  0x30   : > { %297 = vrot.lane.b32.xlu2 %v631_v0, %s592_s24 }
  0x6a   : > { %v230_v3 = vpop.permute.xlu2 %229 }
  0x72   : > { %v201_v12 = vpop.permute.xlu2 %200 }
  0x73   : > { %523 = vmatpush.msk.msra.mxu1 %vm206_vm2, %v201_v12 }
  0x7a   : > { %v300_v17 = vpop.permute.xlu2 %299 }
  0x7b   : > { %529 = vmatpush.xpose.msk.msrb.mxu1 %vm158_vm0, %v300_v17 }
  0x81   : > { %v157_v1 = vpop.permute.xlu0 %156  ;;  %v232_v2 = vpop.permute.xlu1 %231 }
  0x82   : > { %521 = vmatpush.xpose.msk.msra.mxu0 %vm158_vm0, %v157_v1  ;;  %525 = vmatpush.xpose.msk.msra.mxu2 %vm158_vm0, %v232_v2  ;;  %v368_v20 = vpop.permute.xlu2 %367 }
  0x85   : > { %522 = vmatmul.msk.f32.vlgmr.msra.gmra.mxu0 %vm158_vm0, %v631_v0  ;;  %526 = vmatmul.msk.f32.vlgmr.msra.gmra.mxu2 %vm158_vm0, %v230_v3 }
  0x86   : > { %533 = vmatpush.xpose.msk.msrb.mxu0 %vm158_vm0, %v368_v20 }
  0x8a   : > { %v298_v24 = vpop.permute.xlu2 %297 }
 0x102   : > { %v180_v5 = vpop.f32.mrf.mxu0 }
 0x103   : > { %v183_v6 = vmul.f32 0.35355338, %v180_v5 }
 0x105   : > { %v187_v7 = vadd.f32 %v561_v4, %v183_v6 }
 0x107   : > { %v189_v8 = vsel %vm188_vm1, %v187_v7, -inf }
 0x108   : > { %190 = vmax.xlane.f32.xlu0 %v189_v8  ;;  %v254_v15 = vpop.f32.mrf.mxu2 }
 0x109   : > { %v257_v16 = vmul.f32 0.35355338, %v254_v15 }
 0x10b   : > { %v258_v18 = vadd.f32 %v561_v4, %v257_v16 }
 0x10d   : > { %v259_v19 = vsel %vm188_vm1, %v258_v18, -inf }
 0x10e   : > { %260 = vmax.xlane.f32.xlu2 %v259_v19 }
 0x17b   : > { %v191_v9 = vpop.xlane.xlu0 %190 }
 0x17c   : > { %v192_v10 = vsub.f32 %v187_v7, %v191_v9 }
 0x17e   : > { %v193_v11 = vmul.f32 1.442695, %v192_v10 }
 0x180   : > { %562 = vpow2.f32 %v193_v11 }
 0x181   : > { %v261_v27 = vpop.xlane.xlu2 %260 }
 0x182   : > { %v262_v30 = vsub.f32 %v258_v18, %v261_v27 }
 0x184   : > { %v263_v33 = vmul.f32 1.442695, %v262_v30 }
 0x186   : > { %v563_v13 = vpop.eup %562 }
 0x187   : > { %v195_v14 = vsel %vm188_vm1, %v563_v13, 0.0 }
 0x188   : > { %196 = vadd.xlane.f32.xlu1 %v195_v14 }
 0x1a1   : > { %365 = vrot.lane.b32.xlu1 %v631_v0, %s593_s25 }
 0x1fb   : > { %v197_v21 = vpop.xlane.xlu1 %196 }
 0x1fc   : > { %564 = vrcp.f32 %v197_v21 }
 0x1fd   : > { %566 = vpow2.f32 %v263_v33 }
 0x202   : > { %v565_v22 = vpop.eup %564 }
 0x203   : > { %v199_v23 = vmul.f32 %v565_v22, %v563_v13  ;;  %v567_v38 = vpop.eup %566 }
 0x204   : > { %v265_v39 = vsel %vm188_vm1, %v567_v38, 0.0 }
 0x205   : > { %524 = vmatmul.msk.f32.vlgmr.msra.gmra.mxu1 %vm202_vm3, %v199_v23 }
 0x20d   : > { %530 = vmatmul.msk.f32.vlgmr.msrb.gmra.mxu1 %vm158_vm0, %v298_v24 }
 0x213   : > { %v366_v25 = vpop.permute.xlu1 %365 }
 0x214   : > { %534 = vmatmul.msk.f32.vlgmr.msrb.gmra.mxu0 %vm158_vm0, %v366_v25 }
 0x282   : > { %v659_v26 = vpop.f32.mrf.mxu1 }
 0x28a   : > { %v322_v28 = vpop.f32.mrf.mxu1 }
 0x28b   : > { %v325_v29 = vmul.f32 0.35355338, %v322_v28 }
 0x28d   : > { %v326_v31 = vadd.f32 %v561_v4, %v325_v29 }
 0x28f   : > { %v327_v32 = vsel %vm188_vm1, %v326_v31, -inf }
 0x290   : > { %328 = vmax.xlane.f32.xlu1 %v327_v32 }
 0x291   : > { %v390_v34 = vpop.f32.mrf.mxu0 }
 0x292   : > { %v393_v35 = vmul.f32 0.35355338, %v390_v34 }
 0x294   : > { %v394_v36 = vadd.f32 %v561_v4, %v393_v35 }
 0x296   : > { %v395_v37 = vsel %vm188_vm1, %v394_v36, -inf }
 0x297   : > { %396 = vmax.xlane.f32.xlu0 %v395_v37 }
 0x29f   : > { %266 = vadd.xlane.f32.xlu0 %v265_v39 }
 0x2a9   : > { %338 = vrot.lane.b32.xlu1 %v631_v0, %s594_s26 }
 0x303   : > { %v329_v40 = vpop.xlane.xlu1 %328 }
 0x304   : > { %v330_v41 = vsub.f32 %v326_v31, %v329_v40 }
 0x306   : > { %v331_v42 = vmul.f32 1.442695, %v330_v41 }
 0x308   : > { %568 = vpow2.f32 %v331_v42 }
 0x30a   : > { %v397_v43 = vpop.xlane.xlu0 %396 }
 0x30b   : > { %v398_v44 = vsub.f32 %v394_v36, %v397_v43 }
 0x30d   : > { %v399_v45 = vmul.f32 1.442695, %v398_v44 }
 0x30e   : > { %v569_v46 = vpop.eup %568 }
 0x30f   : > { %570 = vpow2.f32 %v399_v45  ;;  %v333_v47 = vsel %vm188_vm1, %v569_v46, 0.0 }
 0x310   : > { %334 = vadd.xlane.f32.xlu0 %v333_v47 }
 0x312   : > { %v267_v50 = vpop.xlane.xlu0 %266 }
 0x315   : > { %v571_v48 = vpop.eup %570 }
 0x316   : > { %v401_v49 = vsel %vm188_vm1, %v571_v48, 0.0 }
 0x317   : > { %402 = vadd.xlane.f32.xlu2 %v401_v49 }
 0x31b   : > { %v339_v58 = vpop.permute.xlu1 %338 }
 0x324   : > { %270 = vrot.lane.b32.xlu0 %v631_v0, %s595_s27 }
 0x32f   : > { %406 = vrot.lane.b32.xlu2 %v631_v0, %s596_s28 }
 0x383   : > { %v335_v52 = vpop.xlane.xlu0 %334 }
 0x38a   : > { %v403_v51 = vpop.xlane.xlu2 %402 }
 0x38b   : > { %572 = vrcp.f32 %v403_v51 }
 0x38c   : > { %574 = vrcp.f32 %v267_v50 }
 0x38d   : > { %576 = vrcp.f32 %v335_v52 }
 0x391   : > { %v573_v53 = vpop.eup %572 }
 0x392   : > { %v407_v54 = vpop.permute.xlu2 %406  ;;  %v405_v55 = vmul.f32 %v573_v53, %v571_v48  ;;  %v575_v56 = vpop.eup %574 }
 0x393   : > { %535 = vmatpush.msk.msrb.mxu2 %vm206_vm2, %v407_v54  ;;  %v269_v59 = vmul.f32 %v575_v56, %v567_v38  ;;  %v577_v60 = vpop.eup %576 }
 0x394   : > { %536 = vmatmul.msk.f32.vlgmr.msrb.gmra.mxu2 %vm202_vm3, %v405_v55  ;;  %v337_v61 = vmul.f32 %v577_v60, %v569_v46 }
 0x396   : > { %v271_v57 = vpop.permute.xlu0 %270 }
 0x397   : > { %527 = vmatpush.msk.msra.mxu3 %vm206_vm2, %v271_v57 }
 0x398   : > { %528 = vmatmul.msk.f32.vlgmr.msra.gmra.mxu3 %vm202_vm3, %v269_v59 }
 0x399   : > { %531 = vmatpush.msk.msrb.mxu3 %vm206_vm2, %v339_v58 }
 0x3a0   : > { %532 = vmatmul.msk.f32.vlgmr.msrb.gmra.mxu3 %vm202_vm3, %v337_v61 }
 0x417   : > { %v430_v62 = vpop.f32.mrf.mxu2 }
 0x418   : > { %442 = vrot.lane.b32.xlu1 %v430_v62, %s597_s29 }
 0x41b   : > { %v294_v63 = vpop.f32.mrf.mxu3 }
 0x41c   : > { %434 = vrot.lane.b32.xlu0 %v294_v63, %s598_s30 }
 0x423   : > { %v362_v0 = vpop.f32.mrf.mxu3 }
 0x424   : > { %438 = vrot.lane.b32.xlu0 %v362_v0, %s599_s3 }
 0x48a   : > { %v443_v4 = vpop.permute.xlu1 %442 }
 0x48e   : > { %v435_v1 = vpop.permute.xlu0 %434 }
 0x48f   : > { %v445_v2 = vsel %vm158_vm0, %v659_v26, %v435_v1 }
 0x496   : > { %v439_v3 = vpop.permute.xlu0 %438 }
 0x497   : > { %v447_v5 = vsel %vm446_vm4, %v445_v2, %v439_v3 }
 0x498   : > { %v449_v6 = vsel %vm448_vm5, %v447_v5, %v443_v4 }
 0x499   : > { %451 = vst.msk [vmem:[%s152_s6] sm:$0x1f] %vm450_vm6, %v449_v6 }
 0x49a PF: > { %s12_s9 = sadd.s32 1, %s584_s9  }
 0x49b   : > { %p9_p4 = scmp.ge.s32.totalorder %s12_s9, 4  }
 0x49d   :  { %11 = sbr.rel (!%p9_p4) target bundleno = 1 (0x1), region = 61 }

// kernel: forward.61
= control target key start
LH: loop header
LB: loop body
LE: loop exit
PB: predicated region body
PF: predicated region fallthrough
CT: control target
= control target key end

     0   :  { %vm16_vm0 = vcmask 261120   ;;  %vm20_vm1 = vcmask 254976   ;;  %v96_v4 = vmov 32.0   ;;  %s141_s0 = inlined_call_operand.vmem [shape: f32[10,32], index: 0, kind: input, shape index: {}]   ;;  %s142_s1 = inlined_call_operand.vmem [shape: f32[1,32], index: 1, kind: input, shape index: {}]   ;;  %s143_s2 = inlined_call_operand.vmem [shape: f32[1,32], index: 2, kind: input, shape index: {}]   ;;  %s144_s3 = inlined_call_operand.vmem [shape: f32[10,32], index: 3, kind: output, shape index: {}]  }
   0x1   :  { %v14_v0 = vld [vmem:[%s141_s0] sm:$0xff]  ;;  %v15_v2 = vld [vmem:[%s141_s0 + $0x8] sm:$0x3]  ;;  %90 = vrcp.f32 %v96_v4 }
   0x2   :  { %v17_v1 = vsel %vm16_vm0, %v14_v0, 0.0  ;;  %v21_v3 = vsel %vm20_vm1, %v15_v2, 0.0  ;;  %v88_v35 = vld [vmem:[%s142_s1] ss:$0 sm:$0xff] }
   0x3   :  { %18 = vadd.xlane.f32.xlu0 %v17_v1  ;;  %v89_v38 = vld [vmem:[%s143_s2] ss:$0 sm:$0xff] }
   0x7   :  { %v91_v5 = vpop.eup %90 }
   0x8   :  { %v25_v6 = vmul.f32 32.0, %v91_v5  ;;  %vm29_vm2 = vweird.f32 %v91_v5 }
   0xa   :  { %v26_v7 = vsub.f32 1.0, %v25_v6 }
   0xb   :  { %22 = vadd.xlane.f32.xlu0 %v21_v3 }
   0xc   :  { %v27_v8 = vmul.f32 %v91_v5, %v26_v7 }
   0xe   :  { %v28_v9 = vadd.f32 %v91_v5, %v27_v8 }
  0x10   :  { %v30_v10 = vsel %vm29_vm2, %v91_v5, %v28_v9 }
  0x76   :  { %v19_v11 = vpop.xlane.xlu0 %18 }
  0x77   :  { %v31_v12 = vmul.f32 %v30_v10, %v19_v11 }
  0x79   :  { %v33_v13 = vsub.f32 %v14_v0, %v31_v12 }
  0x7b   :  { %v35_v14 = vmul.f32 %v33_v13, %v33_v13 }
  0x7d   :  { %v37_v15 = vsel %vm16_vm0, %v35_v14, 0.0 }
  0x7e   :  { %38 = vadd.xlane.f32.xlu1 %v37_v15  ;;  %v23_v16 = vpop.xlane.xlu0 %22 }
  0x7f   :  { %v32_v17 = vmul.f32 %v30_v10, %v23_v16 }
  0x81   :  { %v34_v18 = vsub.f32 %v15_v2, %v32_v17 }
  0x83   :  { %v36_v19 = vmul.f32 %v34_v18, %v34_v18 }
  0x85   :  { %v40_v20 = vsel %vm20_vm1, %v36_v19, 0.0 }
  0x86   :  { %41 = vadd.xlane.f32.xlu1 %v40_v20 }
  0xf1   :  { %v39_v21 = vpop.xlane.xlu1 %38 }
  0xf2   :  { %v43_v22 = vmul.f32 %v39_v21, %v30_v10 }
  0xf4   :  { %v45_v23 = vadd.f32 1e-12, %v43_v22 }
  0xf6   :  { %92 = vrsqrt.f32 %v45_v23  ;;  %vm53_vm4 = vweird.f32 %v45_v23 }
  0xf9   :  { %v42_v24 = vpop.xlane.xlu1 %41 }
  0xfa   :  { %v44_v25 = vmul.f32 %v42_v24, %v30_v10 }
  0xfc   :  { %v93_v26 = vpop.eup %92  ;;  %v46_v27 = vadd.f32 1e-12, %v44_v25 }
  0xfd   :  { %v48_v28 = vmul.f32 %v93_v26, %v45_v23  ;;  %vm54_vm3 = vweird.f32 %v93_v26 }
  0xfe   :  { %94 = vrsqrt.f32 %v46_v27  ;;  %vm55_vm5 = vmor %vm53_vm4, %vm54_vm3  ;;  %vm63_vm7 = vweird.f32 %v46_v27 }
  0xff   :  { %v49_v29 = vmul.f32 %v93_v26, %v48_v28 }
 0x101   :  { %v50_v30 = vmul.f32 0.5, %v49_v29 }
 0x103   :  { %v51_v31 = vsub.f32 1.5, %v50_v30 }
 0x104   :  { %v95_v32 = vpop.eup %94 }
 0x105   :  { %v52_v33 = vmul.f32 %v93_v26, %v51_v31  ;;  %v58_v34 = vmul.f32 %v95_v32, %v46_v27  ;;  %vm64_vm6 = vweird.f32 %v95_v32 }
 0x106   :  { %vm65_vm8 = vmor %vm63_vm7, %vm64_vm6 }
 0x107   :  { %v56_v36 = vsel %vm55_vm5, %v93_v26, %v52_v33  ;;  %v59_v37 = vmul.f32 %v95_v32, %v58_v34 }
 0x108   :  { %v67_v39 = vmul.f32 %v56_v36, %v33_v13 }
 0x109   :  { %v60_v40 = vmul.f32 0.5, %v59_v37 }
 0x10a   :  { %v73_v41 = vmul.f32 %v88_v35, %v67_v39 }
 0x10b   :  { %v61_v42 = vsub.f32 1.5, %v60_v40 }
 0x10c   :  { %v79_v43 = vadd.f32 %v89_v38, %v73_v41 }
 0x10d   :  { %v62_v44 = vmul.f32 %v95_v32, %v61_v42 }
 0x10e   :  { %81 = vst.msk [vmem:[%s144_s3] sm:$0xff] %vm16_vm0, %v79_v43 }
 0x10f   :  { %v66_v45 = vsel %vm65_vm8, %v95_v32, %v62_v44 }
 0x110   :  { %v68_v46 = vmul.f32 %v66_v45, %v34_v18 }
 0x112   :  { %v74_v47 = vmul.f32 %v88_v35, %v68_v46 }
 0x114   :  { %v80_v48 = vadd.f32 %v89_v38, %v74_v47 }
 0x116   :  { %82 = vst.msk [vmem:[%s144_s3 + $0x8] sm:$0x3] %vm20_vm1, %v80_v48 }

// kernel: forward.37
= control target key start
LH: loop header
LB: loop body
LE: loop exit
PB: predicated region body
PF: predicated region fallthrough
CT: control target
= control target key end

     0   :  { %vm24_vm0 = vcmask 261120   ;;  %vm143_vm9 = vcmask 254976   ;;  %s230_s1 = inlined_call_operand.vmem [shape: f32[32,32], index: 1, kind: input, shape index: {}]   ;;  %s231_s2 = inlined_call_operand.vmem [shape: f32[1,32], index: 2, kind: input, shape index: {}]   ;;  %s232_s0 = inlined_call_operand.vmem [shape: f32[10,32], index: 0, kind: input, shape index: {}]   ;;  %s233_s3 = inlined_call_operand.vmem [shape: f32[10,32], index: 3, kind: output, shape index: {}]  }
   0x1   :  { %v19_v0 = vld [vmem:[%s230_s1 + $0x18] sm:$0xff]  ;;  %v18_v1 = vld [vmem:[%s230_s1 + $0x10] sm:$0xff]  ;;  %v17_v2 = vld [vmem:[%s230_s1 + $0x8] sm:$0xff] }
   0x2   :  { %43 = vmatpush.msra.mxu0 %v19_v0  ;;  %153 = vmatpush.msra.mxu1 %v19_v0  ;;  %v16_v3 = vld [vmem:[%s230_s1] sm:$0xff]  ;;  %v15_v5 = vld [vmem:[%s232_s0 + $0x8] sm:$0x3] }
   0x3   :  { %v14_v4 = vld [vmem:[%s232_s0] sm:$0xff] }
   0x4   :  { %44 = vmatpush.msra.mxu0 %v18_v1  ;;  %154 = vmatpush.msra.mxu1 %v18_v1  ;;  %v157_v6 = vld [vmem:[%s231_s2] ss:$0 sm:$0xff] }
   0x6   :  { %45 = vmatpush.msra.mxu0 %v17_v2  ;;  %155 = vmatpush.msra.mxu1 %v17_v2 }
   0x8   :  { %46 = vmatpush.msra.mxu0 %v16_v3  ;;  %156 = vmatpush.msra.mxu1 %v16_v3 }
   0x9   :  { %149 = vmatmul.msk.f32.vlgmr.msra.gmra.mxu0 %vm24_vm0, %v14_v4  ;;  %150 = vmatmul.msk.f32.vlgmr.msra.gmra.mxu1 %vm24_vm0, %v15_v5 }
  0x86   :  { %v48_v7 = vpop.f32.mrf.mxu0  ;;  %v51_v8 = vpop.f32.mrf.mxu1 }
  0x87   :  { %v205_v9 = vadd.f32 %v157_v6, %v48_v7  ;;  %v207_v10 = vadd.f32 %v157_v6, %v51_v8 }
  0x89   :  { %v210_v11 = vmul.f32 0.70710677, %v205_v9  ;;  %v213_v12 = vmul.f32 0.70710677, %v207_v10 }
  0x8b   :  { %v58_v13 = vmul.f32 %v210_v11, %v210_v11  ;;  %v98_v14 = vmul.f32 %v213_v12, %v213_v12 }
  0x8d   :  { %v59_v15 = vmin.f32 %v58_v13, 16.0  ;;  %v99_v16 = vmin.f32 %v98_v14, 16.0 }
  0x8f   :  { %v60_v17 = vmul.f32 2.1237322e-06, %v59_v15  ;;  %v71_v18 = vmul.f32 3.8918573e-05, %v59_v15  ;;  %v100_v19 = vmul.f32 2.1237322e-06, %v99_v16 }
  0x90   :  { %v111_v20 = vmul.f32 3.8918573e-05, %v99_v16 }
  0x91   :  { %v61_v21 = vadd.f32 0.00028619796, %v60_v17  ;;  %v72_v22 = vadd.f32 0.001143296, %v71_v18  ;;  %v101_v23 = vadd.f32 0.00028619796, %v100_v19 }
  0x92   :  { %v112_v24 = vadd.f32 0.001143296, %v111_v20 }
  0x93   :  { %v62_v25 = vmul.f32 %v61_v21, %v59_v15  ;;  %v73_v26 = vmul.f32 %v72_v22, %v59_v15  ;;  %v102_v27 = vmul.f32 %v101_v23, %v99_v16  ;;  %v54_v23 = vmul.f32 0.5, %v205_v9 }
  0x94   :  { %v113_v28 = vmul.f32 %v112_v24, %v99_v16 }
  0x95   :  { %v63_v29 = vadd.f32 0.0036580483, %v62_v25  ;;  %v74_v30 = vadd.f32 0.014752088, %v73_v26  ;;  %v103_v33 = vadd.f32 0.0036580483, %v102_v27 }
  0x96   :  { %v114_v31 = vadd.f32 0.014752088, %v113_v28  ;;  %v55_v25 = vmul.f32 0.5, %v207_v10 }
  0x97   :  { %v75_v32 = vmul.f32 %v74_v30, %v59_v15  ;;  %v64_v35 = vmul.f32 %v63_v29, %v59_v15  ;;  %v104_v39 = vmul.f32 %v103_v33, %v99_v16 }
  0x98   :  { %v115_v34 = vmul.f32 %v114_v31, %v99_v16 }
  0x99   :  { %v76_v36 = vadd.f32 0.112945676, %v75_v32  ;;  %v65_v41 = vadd.f32 0.05243302, %v64_v35  ;;  %v105_v45 = vadd.f32 0.05243302, %v104_v39 }
  0x9a   :  { %v116_v37 = vadd.f32 0.112945676, %v115_v34 }
  0x9b   :  { %v77_v38 = vmul.f32 %v76_v36, %v59_v15  ;;  %v66_v47 = vmul.f32 %v65_v41, %v59_v15  ;;  %v106_v50 = vmul.f32 %v105_v45, %v99_v16 }
  0x9c   :  { %v117_v40 = vmul.f32 %v116_v37, %v99_v16 }
  0x9d   :  { %v78_v42 = vadd.f32 0.4994258, %v77_v38  ;;  %v67_v51 = vadd.f32 0.18741608, %v66_v47  ;;  %v107_v52 = vadd.f32 0.18741608, %v106_v50 }
  0x9e   :  { %v118_v43 = vadd.f32 0.4994258, %v117_v40 }
  0x9f   :  { %v79_v44 = vmul.f32 %v78_v42, %v59_v15  ;;  %v68_v54 = vmul.f32 %v67_v51, %v59_v15  ;;  %v108_v57 = vmul.f32 %v107_v52, %v99_v16 }
  0xa0   :  { %v119_v46 = vmul.f32 %v118_v43, %v99_v16 }
  0xa1   :  { %v80_v48 = vadd.f32 1.0, %v79_v44  ;;  %v69_v60 = vadd.f32 1.1283791, %v68_v54  ;;  %v109_v2 = vadd.f32 1.1283791, %v108_v57 }
  0xa2   :  { %v120_v49 = vadd.f32 1.0, %v119_v46 }
  0xa3   :  { %158 = vrcp.f32 %v80_v48  ;;  %v92_v61 = vand.u32 2147483648, %v80_v48  ;;  %v90_v0 = vand.u32 2147483647, %v80_v48  ;;  %vm86_vm3 = vweird.f32 %v80_v48 }
  0xa4   :  { %160 = vrcp.f32 %v120_v49  ;;  %v132_v1 = vand.u32 2147483648, %v120_v49  ;;  %v130_v4 = vand.u32 2147483647, %v120_v49  ;;  %vm126_vm5 = vweird.f32 %v120_v49 }
  0xa5   :  { %v93_v6 = vor.u32 1.1754944e-38, %v92_v61  ;;  %v70_v8 = vmul.f32 %v69_v60, %v210_v11  ;;  %vm91_vm6 = vcmp.eq.f32.partialorder %v90_v0, 8.507059e+37  ;;  %v110_v16 = vmul.f32 %v109_v2, %v213_v12 }
  0xa6   :  { %v133_v14 = vor.u32 1.1754944e-38, %v132_v1  ;;  %vm131_vm8 = vcmp.eq.f32.partialorder %v130_v4, 8.507059e+37 }
  0xa9   :  { %v159_v53 = vpop.eup %158 }
  0xaa   :  { %v161_v55 = vpop.eup %160  ;;  %v82_v56 = vmul.f32 %v159_v53, %v80_v48  ;;  %vm87_vm1 = vweird.f32 %v159_v53 }
  0xab   :  { %v122_v58 = vmul.f32 %v161_v55, %v120_v49  ;;  %vm127_vm2 = vweird.f32 %v161_v55  ;;  %vm88_vm4 = vmor %vm86_vm3, %vm87_vm1 }
  0xac   :  { %v83_v59 = vsub.f32 1.0, %v82_v56  ;;  %vm128_vm7 = vmor %vm126_vm5, %vm127_vm2 }
  0xad   :  { %v123_v62 = vsub.f32 1.0, %v122_v58 }
  0xae   :  { %v84_v63 = vmul.f32 %v159_v53, %v83_v59 }
  0xaf   :  { %v124_v3 = vmul.f32 %v161_v55, %v123_v62 }
  0xb0   :  { %v85_v5 = vadd.f32 %v159_v53, %v84_v63 }
  0xb1   :  { %v125_v7 = vadd.f32 %v161_v55, %v124_v3 }
  0xb2   :  { %v89_v13 = vsel %vm88_vm4, %v159_v53, %v85_v5 }
  0xb3   :  { %v94_v15 = vsel %vm91_vm6, %v93_v6, %v89_v13  ;;  %v129_v17 = vsel %vm128_vm7, %v161_v55, %v125_v7 }
  0xb4   :  { %v95_v18 = vmul.f32 %v94_v15, %v70_v8  ;;  %v134_v19 = vsel %vm131_vm8, %v133_v14, %v129_v17 }
  0xb5   :  { %v135_v20 = vmul.f32 %v134_v19, %v110_v16 }
  0xb6   :  { %v151_v21 = vclamps-f32 %v95_v18, 1.0 }
  0xb7   :  { %v152_v22 = vclamps-f32 %v135_v20, 1.0 }
  0xb8   :  { %v138_v24 = vadd.f32 1.0, %v151_v21 }
  0xb9   :  { %v139_v11 = vadd.f32 1.0, %v152_v22 }
  0xba   :  { %v140_v26 = vmul.f32 %v138_v24, %v54_v23 }
  0xbb   :  { %v141_v27 = vmul.f32 %v139_v11, %v55_v25 }
  0xbc   :  { %142 = vst.msk [vmem:[%s233_s3] sm:$0xff] %vm24_vm0, %v140_v26 }
  0xbd   :  { %144 = vst.msk [vmem:[%s233_s3 + $0x8] sm:$0x3] %vm143_vm9, %v141_v27 }

// kernel: forward.36
= control target key start
LH: loop header
LB: loop body
LE: loop exit
PB: predicated region body
PF: predicated region fallthrough
CT: control target
= control target key end

     0   :  { %vm32_vm0 = vcmask 254976   ;;  %vm28_vm1 = vcmask 261120   ;;  %v301_v4 = vmov 32.0   ;;  %s462_s0 = inlined_call_operand.vmem [shape: f32[10,32], index: 0, kind: input, shape index: {}]   ;;  %s463_s1 = inlined_call_operand.vmem [shape: f32[1,32], index: 1, kind: input, shape index: {}]   ;;  %s464_s2 = inlined_call_operand.vmem [shape: f32[1,32], index: 2, kind: input, shape index: {}]   ;;  %s465_s4 = inlined_call_operand.vmem [shape: f32[1,64], index: 4, kind: input, shape index: {}]   ;;  %s466_s3 = inlined_call_operand.vmem [shape: f32[32,64], index: 3, kind: input, shape index: {}]   ;;  %s467_s6 = inlined_call_operand.vmem [shape: f32[1,32], index: 6, kind: input, shape index: {}]   ;;  %s468_s5 = inlined_call_operand.vmem [shape: f32[64,32], index: 5, kind: input, shape index: {}]   ;;  %s469_s7 = inlined_call_operand.vmem [shape: f32[10,32], index: 7, kind: output, shape index: {}]  }
   0x1   :  { %v345_v0 = vld [vmem:[%s462_s0 + $0x8] sm:$0x3]  ;;  %v352_v2 = vld [vmem:[%s462_s0] sm:$0xff]  ;;  %291 = vrcp.f32 %v301_v4  ;;  %v96_v21 = vld [vmem:[%s466_s3 + $0x18] sm:$0xff] }
   0x2   :  { %v33_v1 = vsel %vm32_vm0, %v345_v0, 0.0  ;;  %v29_v3 = vsel %vm28_vm1, %v352_v2, 0.0  ;;  %274 = vmatpush.msra.mxu3 %v96_v21  ;;  %119 = vmatpush.msra.mxu0 %v96_v21  ;;  %v95_v22 = vld [vmem:[%s466_s3 + $0x10] sm:$0xff]  ;;  %v94_v23 = vld [vmem:[%s466_s3 + $0x8] sm:$0xff]  ;;  %v93_v24 = vld [vmem:[%s466_s3] sm:$0xff] }
   0x3   :  { %34 = vadd.xlane.f32.xlu0 %v33_v1  ;;  %v287_v39 = vld [vmem:[%s463_s1] ss:$0 sm:$0xff]  ;;  %v225_v63 = vld [vmem:[%s468_s5 + $0x38] sm:$0xff] }
   0x4   :  { %275 = vmatpush.msra.mxu3 %v95_v22  ;;  %120 = vmatpush.msra.mxu0 %v95_v22  ;;  %v288_v43 = vld [vmem:[%s464_s2] ss:$0 sm:$0xff]  ;;  %v220_v22 = vld [vmem:[%s468_s5 + $0x10] sm:$0xff] }
   0x5   :  { %v289_v53 = vld [vmem:[%s465_s4] ss:$0 sm:$0xff]  ;;  %278 = vmatpush.msra.mxu2 %v225_v63  ;;  %245 = vmatpush.msra.mxu1 %v225_v63 }
   0x6   :  { %276 = vmatpush.msra.mxu3 %v94_v23  ;;  %121 = vmatpush.msra.mxu0 %v94_v23 }
   0x7   :  { %v292_v5 = vpop.eup %291 }
   0x8   :  { %v37_v6 = vmul.f32 32.0, %v292_v5  ;;  %vm41_vm2 = vweird.f32 %v292_v5  ;;  %277 = vmatpush.msra.mxu3 %v93_v24  ;;  %122 = vmatpush.msra.mxu0 %v93_v24 }
   0xa   :  { %v38_v7 = vsub.f32 1.0, %v37_v6 }
   0xb   :  { %30 = vadd.xlane.f32.xlu0 %v29_v3 }
   0xc   :  { %v39_v8 = vmul.f32 %v292_v5, %v38_v7 }
   0xe   :  { %v40_v9 = vadd.f32 %v292_v5, %v39_v8 }
  0x10   :  { %v42_v10 = vsel %vm41_vm2, %v292_v5, %v40_v9  ;;  %v224_v5 = vld [vmem:[%s468_s5 + $0x30] sm:$0xff] }
  0x11   :  { %279 = vmatpush.msra.mxu2 %v224_v5  ;;  %246 = vmatpush.msra.mxu1 %v224_v5 }
  0x76   :  { %v35_v11 = vpop.xlane.xlu0 %34 }
  0x77   :  { %v44_v12 = vmul.f32 %v42_v10, %v35_v11 }
  0x79   :  { %v46_v13 = vsub.f32 %v345_v0, %v44_v12 }
  0x7b   :  { %v48_v14 = vmul.f32 %v46_v13, %v46_v13 }
  0x7d   :  { %v52_v15 = vsel %vm32_vm0, %v48_v14, 0.0 }
  0x7e   :  { %53 = vadd.xlane.f32.xlu1 %v52_v15  ;;  %v31_v16 = vpop.xlane.xlu0 %30  ;;  %v222_v15 = vld [vmem:[%s468_s5 + $0x20] sm:$0xff] }
  0x7f   :  { %v43_v17 = vmul.f32 %v42_v10, %v31_v16 }
  0x81   :  { %v45_v18 = vsub.f32 %v352_v2, %v43_v17 }
  0x83   :  { %v47_v19 = vmul.f32 %v45_v18, %v45_v18 }
  0x85   :  { %v49_v20 = vsel %vm28_vm1, %v47_v19, 0.0 }
  0x86   :  { %50 = vadd.xlane.f32.xlu1 %v49_v20  ;;  %v221_v20 = vld [vmem:[%s468_s5 + $0x18] sm:$0xff] }
  0xf1   :  { %v54_v25 = vpop.xlane.xlu1 %53 }
  0xf2   :  { %v56_v26 = vmul.f32 %v54_v25, %v42_v10  ;;  %v219_v25 = vld [vmem:[%s468_s5 + $0x8] sm:$0xff] }
  0xf4   :  { %v58_v27 = vadd.f32 1e-12, %v56_v26 }
  0xf6   :  { %293 = vrsqrt.f32 %v58_v27  ;;  %vm75_vm4 = vweird.f32 %v58_v27 }
  0xf9   :  { %v51_v28 = vpop.xlane.xlu1 %50 }
  0xfa   :  { %v55_v29 = vmul.f32 %v51_v28, %v42_v10  ;;  %v223_v10 = vld [vmem:[%s468_s5 + $0x28] sm:$0xff] }
  0xfb   :  { %280 = vmatpush.msra.mxu2 %v223_v10  ;;  %247 = vmatpush.msra.mxu1 %v223_v10 }
  0xfc   :  { %v294_v30 = vpop.eup %293  ;;  %v57_v31 = vadd.f32 1e-12, %v55_v29  ;;  %v218_v29 = vld [vmem:[%s468_s5] sm:$0xff] }
  0xfd   :  { %v70_v32 = vmul.f32 %v294_v30, %v58_v27  ;;  %vm76_vm3 = vweird.f32 %v294_v30  ;;  %281 = vmatpush.msra.mxu2 %v222_v15  ;;  %248 = vmatpush.msra.mxu1 %v222_v15 }
  0xfe   :  { %295 = vrsqrt.f32 %v57_v31  ;;  %vm77_vm5 = vmor %vm75_vm4, %vm76_vm3  ;;  %vm65_vm7 = vweird.f32 %v57_v31  ;;  %vm230_vm3 = vcmask 523264  }
  0xff   :  { %v71_v33 = vmul.f32 %v294_v30, %v70_v32  ;;  %282 = vmatpush.msra.mxu2 %v221_v20  ;;  %249 = vmatpush.msra.mxu1 %v221_v20 }
 0x101   :  { %v72_v34 = vmul.f32 0.5, %v71_v33  ;;  %283 = vmatpush.msra.mxu2 %v220_v22  ;;  %250 = vmatpush.msra.mxu1 %v220_v22 }
 0x103   :  { %v73_v35 = vsub.f32 1.5, %v72_v34  ;;  %284 = vmatpush.msra.mxu2 %v219_v25  ;;  %251 = vmatpush.msra.mxu1 %v219_v25 }
 0x104   :  { %v296_v36 = vpop.eup %295 }
 0x105   :  { %v74_v37 = vmul.f32 %v294_v30, %v73_v35  ;;  %v60_v38 = vmul.f32 %v296_v36, %v57_v31  ;;  %vm66_vm6 = vweird.f32 %v296_v36  ;;  %285 = vmatpush.msra.mxu2 %v218_v29  ;;  %252 = vmatpush.msra.mxu1 %v218_v29 }
 0x106   :  { %vm67_vm8 = vmor %vm65_vm7, %vm66_vm6 }
 0x107   :  { %v78_v40 = vsel %vm77_vm5, %v294_v30, %v74_v37  ;;  %v61_v41 = vmul.f32 %v296_v36, %v60_v38 }
 0x108   :  { %v80_v42 = vmul.f32 %v78_v40, %v46_v13 }
 0x109   :  { %v62_v44 = vmul.f32 0.5, %v61_v41 }
 0x10a   :  { %v86_v45 = vmul.f32 %v287_v39, %v80_v42 }
 0x10b   :  { %v63_v46 = vsub.f32 1.5, %v62_v44 }
 0x10c   :  { %v92_v47 = vadd.f32 %v288_v43, %v86_v45 }
 0x10d   :  { %v64_v48 = vmul.f32 %v296_v36, %v63_v46 }
 0x10e   :  { %269 = vmatmul.msk.f32.vlgmr.msra.gmra.mxu3 %vm28_vm1, %v92_v47 }
 0x10f   :  { %v68_v49 = vsel %vm67_vm8, %v296_v36, %v64_v48 }
 0x110   :  { %v79_v50 = vmul.f32 %v68_v49, %v45_v18 }
 0x112   :  { %v85_v51 = vmul.f32 %v287_v39, %v79_v50 }
 0x114   :  { %v91_v52 = vadd.f32 %v288_v43, %v85_v51 }
 0x116   :  { %268 = vmatmul.msk.f32.vlgmr.msra.gmra.mxu0 %vm28_vm1, %v91_v52 }
 0x191   :  { %v127_v54 = vpop.f32.mrf.mxu3 }
 0x192   :  { %v383_v55 = vadd.f32 %v289_v53, %v127_v54 }
 0x193   :  { %v124_v56 = vpop.f32.mrf.mxu0 }
 0x194   :  { %v386_v57 = vmul.f32 0.70710677, %v383_v55  ;;  %v388_v58 = vadd.f32 %v289_v53, %v124_v56 }
 0x196   :  { %v174_v59 = vmul.f32 %v386_v57, %v386_v57  ;;  %v393_v60 = vmul.f32 0.70710677, %v388_v58  ;;  %v130_v20 = vmul.f32 0.5, %v388_v58 }
 0x198   :  { %v395_v61 = vmin.f32 %v174_v59, 16.0  ;;  %v134_v62 = vmul.f32 %v393_v60, %v393_v60 }
 0x19a   :  { %v176_v1 = vmul.f32 2.1237322e-06, %v395_v61  ;;  %v187_v3 = vmul.f32 3.8918573e-05, %v395_v61  ;;  %v404_v4 = vmin.f32 %v134_v62, 16.0 }
 0x19c   :  { %v177_v6 = vadd.f32 0.00028619796, %v176_v1  ;;  %v188_v7 = vadd.f32 0.001143296, %v187_v3  ;;  %v136_v8 = vmul.f32 2.1237322e-06, %v404_v4 }
 0x19d   :  { %v147_v9 = vmul.f32 3.8918573e-05, %v404_v4 }
 0x19e   :  { %v178_v11 = vmul.f32 %v177_v6, %v395_v61  ;;  %v189_v12 = vmul.f32 %v188_v7, %v395_v61  ;;  %v137_v13 = vadd.f32 0.00028619796, %v136_v8 }
 0x19f   :  { %v148_v14 = vadd.f32 0.001143296, %v147_v9 }
 0x1a0   :  { %v190_v16 = vadd.f32 0.014752088, %v189_v12  ;;  %v138_v17 = vmul.f32 %v137_v13, %v404_v4  ;;  %v179_v18 = vadd.f32 0.0036580483, %v178_v11 }
 0x1a1   :  { %v149_v19 = vmul.f32 %v148_v14, %v404_v4 }
 0x1a2   :  { %v191_v21 = vmul.f32 %v190_v16, %v395_v61  ;;  %v139_v23 = vadd.f32 0.0036580483, %v138_v17  ;;  %v180_v27 = vmul.f32 %v179_v18, %v395_v61  ;;  %v131_v17 = vmul.f32 0.5, %v383_v55 }
 0x1a3   :  { %v150_v24 = vadd.f32 0.014752088, %v149_v19 }
 0x1a4   :  { %v192_v26 = vadd.f32 0.112945676, %v191_v21  ;;  %v140_v31 = vmul.f32 %v139_v23, %v404_v4  ;;  %v181_v34 = vadd.f32 0.05243302, %v180_v27 }
 0x1a5   :  { %v151_v28 = vmul.f32 %v150_v24, %v404_v4 }
 0x1a6   :  { %v193_v30 = vmul.f32 %v192_v26, %v395_v61  ;;  %v141_v37 = vadd.f32 0.05243302, %v140_v31  ;;  %v182_v40 = vmul.f32 %v181_v34, %v395_v61 }
 0x1a7   :  { %v152_v32 = vadd.f32 0.112945676, %v151_v28 }
 0x1a8   :  { %v194_v33 = vadd.f32 0.4994258, %v193_v30  ;;  %v142_v42 = vmul.f32 %v141_v37, %v404_v4  ;;  %v183_v44 = vadd.f32 0.18741608, %v182_v40 }
 0x1a9   :  { %v153_v35 = vmul.f32 %v152_v32, %v404_v4 }
 0x1aa   :  { %v195_v36 = vmul.f32 %v194_v33, %v395_v61  ;;  %v143_v45 = vadd.f32 0.18741608, %v142_v42  ;;  %v184_v47 = vmul.f32 %v183_v44, %v395_v61 }
 0x1ab   :  { %v154_v38 = vadd.f32 0.4994258, %v153_v35 }
 0x1ac   :  { %v196_v39 = vadd.f32 1.0, %v195_v36  ;;  %v144_v51 = vmul.f32 %v143_v45, %v404_v4  ;;  %v185_v54 = vadd.f32 1.1283791, %v184_v47 }
 0x1ad   :  { %v155_v41 = vmul.f32 %v154_v38, %v404_v4 }
 0x1ae   :  { %297 = vrcp.f32 %v196_v39  ;;  %v208_v52 = vand.u32 2147483648, %v196_v39  ;;  %v206_v59 = vand.u32 2147483647, %v196_v39  ;;  %vm202_vm10 = vweird.f32 %v196_v39 }
 0x1af   :  { %v156_v43 = vadd.f32 1.0, %v155_v41  ;;  %v145_v1 = vadd.f32 1.1283791, %v144_v51  ;;  %v186_v7 = vmul.f32 %v185_v54, %v386_v57 }
 0x1b0   :  { %v209_v5 = vor.u32 1.1754944e-38, %v208_v52  ;;  %vm207_vm13 = vcmp.eq.f32.partialorder %v206_v59, 8.507059e+37 }
 0x1b1   :  { %299 = vrcp.f32 %v156_v43  ;;  %v168_v3 = vand.u32 2147483648, %v156_v43  ;;  %v166_v61 = vand.u32 2147483647, %v156_v43  ;;  %vm162_vm14 = vweird.f32 %v156_v43 }
 0x1b2   :  { %v146_v12 = vmul.f32 %v145_v1, %v393_v60  ;;  %v290_v60 = vld [vmem:[%s467_s6] ss:$0 sm:$0xff] }
 0x1b3   :  { %v169_v11 = vor.u32 1.1754944e-38, %v168_v3  ;;  %vm167_vm2 = vcmp.eq.f32.partialorder %v166_v61, 8.507059e+37 }
 0x1b4   :  { %v298_v46 = vpop.eup %297 }
 0x1b5   :  { %v198_v48 = vmul.f32 %v298_v46, %v196_v39  ;;  %vm203_vm9 = vweird.f32 %v298_v46 }
 0x1b6   :  { %vm204_vm11 = vmor %vm202_vm10, %vm203_vm9 }
 0x1b7   :  { %v300_v49 = vpop.eup %299  ;;  %v199_v50 = vsub.f32 1.0, %v198_v48 }
 0x1b8   :  { %v158_v53 = vmul.f32 %v300_v49, %v156_v43  ;;  %vm163_vm12 = vweird.f32 %v300_v49 }
 0x1b9   :  { %v200_v56 = vmul.f32 %v298_v46, %v199_v50  ;;  %vm164_vm15 = vmor %vm162_vm14, %vm163_vm12 }
 0x1ba   :  { %v159_v62 = vsub.f32 1.0, %v158_v53 }
 0x1bb   :  { %v201_v63 = vadd.f32 %v298_v46, %v200_v56 }
 0x1bc   :  { %v160_v6 = vmul.f32 %v300_v49, %v159_v62 }
 0x1bd   :  { %v205_v8 = vsel %vm204_vm11, %v298_v46, %v201_v63 }
 0x1be   :  { %v210_v4 = vsel %vm207_vm13, %v209_v5, %v205_v8  ;;  %v161_v9 = vadd.f32 %v300_v49, %v160_v6 }
 0x1bf   :  { %v211_v10 = vmul.f32 %v210_v4, %v186_v7 }
 0x1c0   :  { %v165_v13 = vsel %vm164_vm15, %v300_v49, %v161_v9 }
 0x1c1   :  { %v170_v14 = vsel %vm167_vm2, %v169_v11, %v165_v13  ;;  %v271_v15 = vclamps-f32 %v211_v10, 1.0 }
 0x1c2   :  { %v171_v16 = vmul.f32 %v170_v14, %v146_v12 }
 0x1c3   :  { %v215_v18 = vadd.f32 1.0, %v271_v15 }
 0x1c4   :  { %v270_v57 = vclamps-f32 %v171_v16, 1.0 }
 0x1c5   :  { %v217_v19 = vmul.f32 %v215_v18, %v131_v17 }
 0x1c6   :  { %v214_v21 = vadd.f32 1.0, %v270_v57 }
 0x1c7   :  { %273 = vmatmul.msk.f32.vlgmr.msra.gmra.mxu2 %vm230_vm3, %v217_v19 }
 0x1c8   :  { %v216_v22 = vmul.f32 %v214_v21, %v130_v20 }
 0x1ca   :  { %272 = vmatmul.msk.f32.vlgmr.msra.gmra.mxu1 %vm230_vm3, %v216_v22 }
 0x247   :  { %v254_v23 = vpop.f32.mrf.mxu1 }
 0x248   :  { %v255_v24 = vadd.f32 %v290_v60, %v254_v23 }
 0x24a   :  { %v260_v25 = vadd.f32 %v255_v24, %v352_v2  ;;  %v257_v26 = vpop.f32.mrf.mxu2 }
 0x24b   :  { %v258_v55 = vadd.f32 %v290_v60, %v257_v26 }
 0x24c   :  { %262 = vst.msk [vmem:[%s469_s7] sm:$0xff] %vm28_vm1, %v260_v25 }
 0x24d   :  { %v261_v58 = vadd.f32 %v258_v55, %v345_v0 }
 0x24f   :  { %263 = vst.msk [vmem:[%s469_s7 + $0x8] sm:$0x3] %vm32_vm0, %v261_v58 }

</bundles_post_ra>
